<compile_context>
chip_gen: v7x
topology: tpu7x:2x2x1
jax: 0.10.0
libtpu: 0.0.40
codegen_flags: <defaults>
</compile_context>

<pallas_src>
import functools

import numpy as np
import jax
import jax.numpy as jnp
from jax.experimental import pallas as pl
from jax.experimental.pallas import tpu as pltpu


def _round_up(x, m):
    return ((x + m - 1) // m) * m


# ----------------------------- Pallas kernel -------------------------------

def _recursive_nn_kernel(l_pad, m_max, n_levels,            # static (closure)
                         left_ref, right_ref,                # SMEM prefetch
                         leaf_ref, w1_ref, w2_ref, wb_ref,   # VMEM inputs
                         p_ref, pb_ref,
                         out_ref,                            # VMEM output
                         hstate, lbuf, rbuf):                # VMEM scratch
    # ---- leaves: one batched relu over the pre-gathered embeddings ---------
    hstate[pl.ds(0, l_pad), :] = jnp.maximum(leaf_ref[...], 0.0)

    # ---- internal levels bottom-up: gather children, one matmul per level --
    for lvl in range(n_levels):
        base = lvl * m_max
        off = l_pad + lvl * m_max                  # static, multiple of 8
        for j in range(m_max):                     # static unroll: row gather
            li = left_ref[base + j]                # SMEM scalar reads
            ri = right_ref[base + j]
            lbuf[pl.ds(j, 1), :] = hstate[pl.ds(li, 1), :]
            rbuf[pl.ds(j, 1), :] = hstate[pl.ds(ri, 1), :]
        # relu(W @ cat(hl, hr) + b) == relu(hl @ W1 + hr @ W2 + b), batched
        pre = (jnp.dot(lbuf[...], w1_ref[...], preferred_element_type=jnp.float32)
               + jnp.dot(rbuf[...], w2_ref[...], preferred_element_type=jnp.float32)
               + wb_ref[...])
        hstate[pl.ds(off, m_max), :] = jnp.maximum(pre, 0.0)

    # ---- projection: one batched (R, D) @ (D, C) matmul, lane-dense store --
    out_ref[...] = (jnp.dot(hstate[...], p_ref[...],
                            preferred_element_type=jnp.float32)
                    + pb_ref[...])


# ------------------------------ JAX wrapper ---------------------------------

def recursive_nn_forward(tree, emb, W, Wb, Pw, Pb):
    """RecursiveNN.forward: returns (num_nodes, num_class) logits in the
    PyTorch post-order traversal (append) order."""
    V, D = emb.shape
    C = Pw.shape[0]
    D_PAD = _round_up(D, 128)
    C_PAD = _round_up(C, 128)

    L = int(tree["leaf_words"].shape[0])
    L_PAD = tree["l_pad"]
    M_MAX = tree["m_max"]
    N_LEVELS = tree["n_levels"]
    R = L_PAD + N_LEVELS * M_MAX                   # rows in comp layout

    # Pre-gather leaf embeddings on the host side (vocab never enters VMEM).
    leaf_emb = jnp.take(emb, jnp.asarray(tree["leaf_words"]), axis=0)
    leaf_emb = jnp.pad(leaf_emb, ((0, L_PAD - L), (0, D_PAD - D)))

    # nn.Linear(2D, D):  x @ W.T + b  ==  x_l @ W.T[:D] + x_r @ W.T[D:] + b
    Wt = W.T                                       # (2D, D)
    w1 = jnp.pad(Wt[:D, :], ((0, D_PAD - D), (0, D_PAD - D)))
    w2 = jnp.pad(Wt[D:, :], ((0, D_PAD - D), (0, D_PAD - D)))
    wb = jnp.pad(Wb.reshape(1, D), ((0, 0), (0, D_PAD - D)))
    # nn.Linear(D, C) projection, stored transposed (D, C) and padded.
    pw = jnp.pad(Pw.T, ((0, D_PAD - D), (0, C_PAD - C)))
    pb = jnp.pad(Pb.reshape(1, C), ((0, 0), (0, C_PAD - C)))

    kernel = functools.partial(_recursive_nn_kernel, L_PAD, M_MAX, N_LEVELS)
    full2d = lambda shape: pl.BlockSpec(shape, lambda i, *_: (0, 0))

    grid_spec = pltpu.PrefetchScalarGridSpec(
        num_scalar_prefetch=2,                     # left_comp, right_comp
        grid=(1,),
        in_specs=[
            full2d((L_PAD, D_PAD)),                # pre-gathered leaf emb
            full2d((D_PAD, D_PAD)),                # W1 (left half of W^T)
            full2d((D_PAD, D_PAD)),                # W2 (right half of W^T)
            full2d((1, D_PAD)),                    # W bias
            full2d((D_PAD, C_PAD)),                # projection weight
            full2d((1, C_PAD)),                    # projection bias
        ],
        out_specs=pl.BlockSpec((R, C_PAD), lambda i, *_: (0, 0)),
        scratch_shapes=[
            pltpu.VMEM((R, D_PAD), jnp.float32),      # hidden states
            pltpu.VMEM((M_MAX, D_PAD), jnp.float32),  # gathered left children
            pltpu.VMEM((M_MAX, D_PAD), jnp.float32),  # gathered right children
        ],
    )

    out_levels = pl.pallas_call(
        kernel,
        out_shape=jax.ShapeDtypeStruct((R, C_PAD), jnp.float32),
        grid_spec=grid_spec,
        compiler_params=pltpu.CompilerParams(
            dimension_semantics=("arbitrary",)),
    )(jnp.asarray(tree["left_comp"]), jnp.asarray(tree["right_comp"]),
      leaf_emb, w1, w2, wb, pw, pb)

    # Back to PyTorch post-order and drop the padding rows / lanes.
    out_post = jnp.take(out_levels, jnp.asarray(tree["post2comp"]), axis=0)
    return out_post[:, :C]


# ------------------------- host-side tree linearizer ------------------------

def build_tree(num_leaves, vocab_size):
    """Balanced binary tree over `num_leaves` leaves.

    Returns post-order arrays (== RecursiveNN.traverse append order) plus the
    level-batched linearization consumed by the Pallas kernel."""
    node_type, word_id, left_idx, right_idx = [], [], [], []

    def build(lo, hi):
        if hi - lo == 1:
            idx = len(node_type)
            node_type.append(1); word_id.append(lo % vocab_size)
            left_idx.append(-1); right_idx.append(-1)
            return idx
        mid = (lo + hi) // 2
        l = build(lo, mid)
        r = build(mid, hi)
        idx = len(node_type)
        node_type.append(0); word_id.append(0)
        left_idx.append(l); right_idx.append(r)
        return idx

    build(0, num_leaves)
    N = len(node_type)

    # level 0 = leaves; internal node level = max(child levels) + 1.
    # Post-order => children precede parents, so one forward pass suffices.
    level = [0] * N
    for i in range(N):
        if node_type[i] == 0:
            level[i] = max(level[left_idx[i]], level[right_idx[i]]) + 1
    n_levels = max(level) if N > 1 else 0

    leaves = [i for i in range(N) if node_type[i] == 1]
    per_level = [[i for i in range(N) if node_type[i] == 0 and level[i] == l]
                 for l in range(1, n_levels + 1)]

    L = len(leaves)
    l_pad = _round_up(max(L, 1), 8)
    m_max = _round_up(max([len(p) for p in per_level] + [1]), 8)

    post2comp = np.zeros(N, np.int32)
    for j, i in enumerate(leaves):
        post2comp[i] = j
    for l, nodes in enumerate(per_level):
        for j, i in enumerate(nodes):
            post2comp[i] = l_pad + l * m_max + j

    left_comp = np.zeros(max(n_levels, 1) * m_max, np.int32)
    right_comp = np.zeros(max(n_levels, 1) * m_max, np.int32)
    for l, nodes in enumerate(per_level):
        for j, i in enumerate(nodes):
            left_comp[l * m_max + j] = post2comp[left_idx[i]]
            right_comp[l * m_max + j] = post2comp[right_idx[i]]

    leaf_words = np.array([word_id[i] for i in leaves], np.int32)

    return dict(
        node_type=np.asarray(node_type, np.int32),
        word_id=np.asarray(word_id, np.int32),
        left_idx=np.asarray(left_idx, np.int32),
        right_idx=np.asarray(right_idx, np.int32),
        leaf_words=leaf_words,
        left_comp=left_comp, right_comp=right_comp,
        post2comp=post2comp,
        l_pad=l_pad, m_max=m_max, n_levels=n_levels,
    )


# ------------------------------ numpy reference ------------------------------

def reference_forward(node_type, word_id, left_idx, right_idx, emb, W, Wb, Pw, Pb):
    N = node_type.shape[0]
    D = emb.shape[1]
    C = Pw.shape[0]
    h = np.zeros((N, D), np.float32)
    out = np.zeros((N, C), np.float32)
    Wt = W.T
    for i in range(N):
        if node_type[i] == 1:
            hi = np.maximum(emb[word_id[i]], 0.0)
        else:
            x = np.concatenate([h[left_idx[i]], h[right_idx[i]]])
            hi = np.maximum(x @ Wt + Wb, 0.0)
        h[i] = hi
        out[i] = hi @ Pw.T + Pb
    return out


# ----------------------------------- main -----------------------------------

if __name__ == "__main__":
    vocab_size, embed_dim, num_class = 20, 32, 5
    num_leaves = 8                                   # -> 15 tree nodes

    key = jax.random.PRNGKey(0)
    k_emb, k_w, k_wb, k_p, k_pb = jax.random.split(key, 5)

    # nn.Embedding(vocab, D).weight
    emb = jax.random.normal(k_emb, (vocab_size, embed_dim), jnp.float32) * 0.1
    # nn.Linear(2D, D): weight (D, 2D), bias (D,)
    W = jax.random.normal(k_w, (embed_dim, 2 * embed_dim), jnp.float32) * 0.1
    Wb = jax.random.normal(k_wb, (embed_dim,), jnp.float32) * 0.1
    # nn.Linear(D, num_class): weight (C, D), bias (C,)
    Pw = jax.random.normal(k_p, (num_class, embed_dim), jnp.float32) * 0.1
    Pb = jax.random.normal(k_pb, (num_class,), jnp.float32) * 0.1

    tree = build_tree(num_leaves, vocab_size)

    out = recursive_nn_forward(tree, emb, W, Wb, Pw, Pb)
    out = jax.block_until_ready(out)

    ref = reference_forward(tree["node_type"], tree["word_id"],
                            tree["left_idx"], tree["right_idx"],
                            np.asarray(emb), np.asarray(W), np.asarray(Wb),
                            np.asarray(Pw), np.asarray(Pb))
    np.testing.assert_allclose(np.asarray(out), ref, rtol=1e-5, atol=1e-5)

    # TODO(synk): get_loss / evaluate (cross-entropy, label collection,
    # progressbar loop) are training/eval utilities, not part of forward.
    print("KERNEL_OK")
</pallas_src>

<mosaic_0001>
module attributes {stable_mosaic.version = 11 : i64} {
  func.func @_recursive_nn_kernel(%arg0: i32, %arg1: memref<24xi32, #tpu.memory_space<smem>>, %arg2: memref<24xi32, #tpu.memory_space<smem>>, %arg3: memref<8x128xf32, #tpu.memory_space<vmem>>, %arg4: memref<128x128xf32, #tpu.memory_space<vmem>>, %arg5: memref<128x128xf32, #tpu.memory_space<vmem>>, %arg6: memref<1x128xf32, #tpu.memory_space<vmem>>, %arg7: memref<128x128xf32, #tpu.memory_space<vmem>>, %arg8: memref<1x128xf32, #tpu.memory_space<vmem>>, %arg9: memref<32x128xf32, #tpu.memory_space<vmem>>, %arg10: memref<32x128xf32, #tpu.memory_space<vmem>>, %arg11: memref<8x128xf32, #tpu.memory_space<vmem>>, %arg12: memref<8x128xf32, #tpu.memory_space<vmem>>) attributes {dimension_semantics = [#tpu.dimension_semantics<arbitrary>], iteration_bounds = array<i64: 1>, scalar_prefetch = 2 : i64, scratch_operands = 3 : i64, tpu.core_type = #tpu.core_type<tc>, window_params = [{pipeline_mode = #tpu.pipeline_mode<synchronous>, transform_indices = @transform_0, window_bounds = array<i64: 8, 128>}, {pipeline_mode = #tpu.pipeline_mode<synchronous>, transform_indices = @transform_1, window_bounds = array<i64: 128, 128>}, {pipeline_mode = #tpu.pipeline_mode<synchronous>, transform_indices = @transform_2, window_bounds = array<i64: 128, 128>}, {pipeline_mode = #tpu.pipeline_mode<synchronous>, transform_indices = @transform_3, window_bounds = array<i64: 1, 128>}, {pipeline_mode = #tpu.pipeline_mode<synchronous>, transform_indices = @transform_4, window_bounds = array<i64: 128, 128>}, {pipeline_mode = #tpu.pipeline_mode<synchronous>, transform_indices = @transform_5, window_bounds = array<i64: 1, 128>}, {pipeline_mode = #tpu.pipeline_mode<synchronous>, transform_indices = @transform_6, window_bounds = array<i64: 32, 128>}]} {
    %c0 = arith.constant 0 : index
    %c0_0 = arith.constant 0 : index
    %0 = vector.load %arg3[%c0, %c0_0] : memref<8x128xf32, #tpu.memory_space<vmem>>, vector<8x128xf32>
    %cst = arith.constant 0.000000e+00 : f32
    %1 = vector.broadcast %cst : f32 to vector<8x128xf32>
    %2 = arith.maximumf %0, %1 : vector<8x128xf32>
    %c0_1 = arith.constant 0 : index
    %c0_2 = arith.constant 0 : index
    %3 = vector.load %arg10[%c0_1, %c0_2] : memref<32x128xf32, #tpu.memory_space<vmem>>, vector<8x128xf32>
    tpu.vector_store %arg10[%c0_1, %c0_2], %2 {strides = array<i32>} : memref<32x128xf32, #tpu.memory_space<vmem>>, vector<8x128xf32>,
    %c0_3 = arith.constant 0 : index
    %4 = memref.load %arg1[%c0_3] : memref<24xi32, #tpu.memory_space<smem>>
    %c0_4 = arith.constant 0 : index
    %5 = memref.load %arg2[%c0_4] : memref<24xi32, #tpu.memory_space<smem>>
    %6 = arith.index_cast %4 : i32 to index
    %c0_5 = arith.constant 0 : index
    %7 = vector.load %arg10[%6, %c0_5] : memref<32x128xf32, #tpu.memory_space<vmem>>, vector<1x128xf32>
    %c0_6 = arith.constant 0 : index
    %c0_7 = arith.constant 0 : index
    %8 = vector.load %arg11[%c0_6, %c0_7] : memref<8x128xf32, #tpu.memory_space<vmem>>, vector<1x128xf32>
    tpu.vector_store %arg11[%c0_6, %c0_7], %7 {strides = array<i32>} : memref<8x128xf32, #tpu.memory_space<vmem>>, vector<1x128xf32>,
    %9 = arith.index_cast %5 : i32 to index
    %c0_8 = arith.constant 0 : index
    %10 = vector.load %arg10[%9, %c0_8] : memref<32x128xf32, #tpu.memory_space<vmem>>, vector<1x128xf32>
    %c0_9 = arith.constant 0 : index
    %c0_10 = arith.constant 0 : index
    %11 = vector.load %arg12[%c0_9, %c0_10] : memref<8x128xf32, #tpu.memory_space<vmem>>, vector<1x128xf32>
    tpu.vector_store %arg12[%c0_9, %c0_10], %10 {strides = array<i32>} : memref<8x128xf32, #tpu.memory_space<vmem>>, vector<1x128xf32>,
    %c1 = arith.constant 1 : index
    %12 = memref.load %arg1[%c1] : memref<24xi32, #tpu.memory_space<smem>>
    %c1_11 = arith.constant 1 : index
    %13 = memref.load %arg2[%c1_11] : memref<24xi32, #tpu.memory_space<smem>>
    %14 = arith.index_cast %12 : i32 to index
    %c0_12 = arith.constant 0 : index
    %15 = vector.load %arg10[%14, %c0_12] : memref<32x128xf32, #tpu.memory_space<vmem>>, vector<1x128xf32>
    %c1_13 = arith.constant 1 : index
    %c0_14 = arith.constant 0 : index
    %16 = vector.load %arg11[%c1_13, %c0_14] : memref<8x128xf32, #tpu.memory_space<vmem>>, vector<1x128xf32>
    tpu.vector_store %arg11[%c1_13, %c0_14], %15 {strides = array<i32>} : memref<8x128xf32, #tpu.memory_space<vmem>>, vector<1x128xf32>,
    %17 = arith.index_cast %13 : i32 to index
    %c0_15 = arith.constant 0 : index
    %18 = vector.load %arg10[%17, %c0_15] : memref<32x128xf32, #tpu.memory_space<vmem>>, vector<1x128xf32>
    %c1_16 = arith.constant 1 : index
    %c0_17 = arith.constant 0 : index
    %19 = vector.load %arg12[%c1_16, %c0_17] : memref<8x128xf32, #tpu.memory_space<vmem>>, vector<1x128xf32>
    tpu.vector_store %arg12[%c1_16, %c0_17], %18 {strides = array<i32>} : memref<8x128xf32, #tpu.memory_space<vmem>>, vector<1x128xf32>,
    %c2 = arith.constant 2 : index
    %20 = memref.load %arg1[%c2] : memref<24xi32, #tpu.memory_space<smem>>
    %c2_18 = arith.constant 2 : index
    %21 = memref.load %arg2[%c2_18] : memref<24xi32, #tpu.memory_space<smem>>
    %22 = arith.index_cast %20 : i32 to index
    %c0_19 = arith.constant 0 : index
    %23 = vector.load %arg10[%22, %c0_19] : memref<32x128xf32, #tpu.memory_space<vmem>>, vector<1x128xf32>
    %c2_20 = arith.constant 2 : index
    %c0_21 = arith.constant 0 : index
    %24 = vector.load %arg11[%c2_20, %c0_21] : memref<8x128xf32, #tpu.memory_space<vmem>>, vector<1x128xf32>
    tpu.vector_store %arg11[%c2_20, %c0_21], %23 {strides = array<i32>} : memref<8x128xf32, #tpu.memory_space<vmem>>, vector<1x128xf32>,
    %25 = arith.index_cast %21 : i32 to index
    %c0_22 = arith.constant 0 : index
    %26 = vector.load %arg10[%25, %c0_22] : memref<32x128xf32, #tpu.memory_space<vmem>>, vector<1x128xf32>
    %c2_23 = arith.constant 2 : index
    %c0_24 = arith.constant 0 : index
    %27 = vector.load %arg12[%c2_23, %c0_24] : memref<8x128xf32, #tpu.memory_space<vmem>>, vector<1x128xf32>
    tpu.vector_store %arg12[%c2_23, %c0_24], %26 {strides = array<i32>} : memref<8x128xf32, #tpu.memory_space<vmem>>, vector<1x128xf32>,
    %c3 = arith.constant 3 : index
    %28 = memref.load %arg1[%c3] : memref<24xi32, #tpu.memory_space<smem>>
    %c3_25 = arith.constant 3 : index
    %29 = memref.load %arg2[%c3_25] : memref<24xi32, #tpu.memory_space<smem>>
    %30 = arith.index_cast %28 : i32 to index
    %c0_26 = arith.constant 0 : index
    %31 = vector.load %arg10[%30, %c0_26] : memref<32x128xf32, #tpu.memory_space<vmem>>, vector<1x128xf32>
    %c3_27 = arith.constant 3 : index
    %c0_28 = arith.constant 0 : index
    %32 = vector.load %arg11[%c3_27, %c0_28] : memref<8x128xf32, #tpu.memory_space<vmem>>, vector<1x128xf32>
    tpu.vector_store %arg11[%c3_27, %c0_28], %31 {strides = array<i32>} : memref<8x128xf32, #tpu.memory_space<vmem>>, vector<1x128xf32>,
    %33 = arith.index_cast %29 : i32 to index
    %c0_29 = arith.constant 0 : index
    %34 = vector.load %arg10[%33, %c0_29] : memref<32x128xf32, #tpu.memory_space<vmem>>, vector<1x128xf32>
    %c3_30 = arith.constant 3 : index
    %c0_31 = arith.constant 0 : index
    %35 = vector.load %arg12[%c3_30, %c0_31] : memref<8x128xf32, #tpu.memory_space<vmem>>, vector<1x128xf32>
    tpu.vector_store %arg12[%c3_30, %c0_31], %34 {strides = array<i32>} : memref<8x128xf32, #tpu.memory_space<vmem>>, vector<1x128xf32>,
    %c4 = arith.constant 4 : index
    %36 = memref.load %arg1[%c4] : memref<24xi32, #tpu.memory_space<smem>>
    %c4_32 = arith.constant 4 : index
    %37 = memref.load %arg2[%c4_32] : memref<24xi32, #tpu.memory_space<smem>>
    %38 = arith.index_cast %36 : i32 to index
    %c0_33 = arith.constant 0 : index
    %39 = vector.load %arg10[%38, %c0_33] : memref<32x128xf32, #tpu.memory_space<vmem>>, vector<1x128xf32>
    %c4_34 = arith.constant 4 : index
    %c0_35 = arith.constant 0 : index
    %40 = vector.load %arg11[%c4_34, %c0_35] : memref<8x128xf32, #tpu.memory_space<vmem>>, vector<1x128xf32>
    tpu.vector_store %arg11[%c4_34, %c0_35], %39 {strides = array<i32>} : memref<8x128xf32, #tpu.memory_space<vmem>>, vector<1x128xf32>,
    %41 = arith.index_cast %37 : i32 to index
    %c0_36 = arith.constant 0 : index
    %42 = vector.load %arg10[%41, %c0_36] : memref<32x128xf32, #tpu.memory_space<vmem>>, vector<1x128xf32>
    %c4_37 = arith.constant 4 : index
    %c0_38 = arith.constant 0 : index
    %43 = vector.load %arg12[%c4_37, %c0_38] : memref<8x128xf32, #tpu.memory_space<vmem>>, vector<1x128xf32>
    tpu.vector_store %arg12[%c4_37, %c0_38], %42 {strides = array<i32>} : memref<8x128xf32, #tpu.memory_space<vmem>>, vector<1x128xf32>,
    %c5 = arith.constant 5 : index
    %44 = memref.load %arg1[%c5] : memref<24xi32, #tpu.memory_space<smem>>
    %c5_39 = arith.constant 5 : index
    %45 = memref.load %arg2[%c5_39] : memref<24xi32, #tpu.memory_space<smem>>
    %46 = arith.index_cast %44 : i32 to index
    %c0_40 = arith.constant 0 : index
    %47 = vector.load %arg10[%46, %c0_40] : memref<32x128xf32, #tpu.memory_space<vmem>>, vector<1x128xf32>
    %c5_41 = arith.constant 5 : index
    %c0_42 = arith.constant 0 : index
    %48 = vector.load %arg11[%c5_41, %c0_42] : memref<8x128xf32, #tpu.memory_space<vmem>>, vector<1x128xf32>
    tpu.vector_store %arg11[%c5_41, %c0_42], %47 {strides = array<i32>} : memref<8x128xf32, #tpu.memory_space<vmem>>, vector<1x128xf32>,
    %49 = arith.index_cast %45 : i32 to index
    %c0_43 = arith.constant 0 : index
    %50 = vector.load %arg10[%49, %c0_43] : memref<32x128xf32, #tpu.memory_space<vmem>>, vector<1x128xf32>
    %c5_44 = arith.constant 5 : index
    %c0_45 = arith.constant 0 : index
    %51 = vector.load %arg12[%c5_44, %c0_45] : memref<8x128xf32, #tpu.memory_space<vmem>>, vector<1x128xf32>
    tpu.vector_store %arg12[%c5_44, %c0_45], %50 {strides = array<i32>} : memref<8x128xf32, #tpu.memory_space<vmem>>, vector<1x128xf32>,
    %c6 = arith.constant 6 : index
    %52 = memref.load %arg1[%c6] : memref<24xi32, #tpu.memory_space<smem>>
    %c6_46 = arith.constant 6 : index
    %53 = memref.load %arg2[%c6_46] : memref<24xi32, #tpu.memory_space<smem>>
    %54 = arith.index_cast %52 : i32 to index
    %c0_47 = arith.constant 0 : index
    %55 = vector.load %arg10[%54, %c0_47] : memref<32x128xf32, #tpu.memory_space<vmem>>, vector<1x128xf32>
    %c6_48 = arith.constant 6 : index
    %c0_49 = arith.constant 0 : index
    %56 = vector.load %arg11[%c6_48, %c0_49] : memref<8x128xf32, #tpu.memory_space<vmem>>, vector<1x128xf32>
    tpu.vector_store %arg11[%c6_48, %c0_49], %55 {strides = array<i32>} : memref<8x128xf32, #tpu.memory_space<vmem>>, vector<1x128xf32>,
    %57 = arith.index_cast %53 : i32 to index
    %c0_50 = arith.constant 0 : index
    %58 = vector.load %arg10[%57, %c0_50] : memref<32x128xf32, #tpu.memory_space<vmem>>, vector<1x128xf32>
    %c6_51 = arith.constant 6 : index
    %c0_52 = arith.constant 0 : index
    %59 = vector.load %arg12[%c6_51, %c0_52] : memref<8x128xf32, #tpu.memory_space<vmem>>, vector<1x128xf32>
    tpu.vector_store %arg12[%c6_51, %c0_52], %58 {strides = array<i32>} : memref<8x128xf32, #tpu.memory_space<vmem>>, vector<1x128xf32>,
    %c7 = arith.constant 7 : index
    %60 = memref.load %arg1[%c7] : memref<24xi32, #tpu.memory_space<smem>>
    %c7_53 = arith.constant 7 : index
    %61 = memref.load %arg2[%c7_53] : memref<24xi32, #tpu.memory_space<smem>>
    %62 = arith.index_cast %60 : i32 to index
    %c0_54 = arith.constant 0 : index
    %63 = vector.load %arg10[%62, %c0_54] : memref<32x128xf32, #tpu.memory_space<vmem>>, vector<1x128xf32>
    %c7_55 = arith.constant 7 : index
    %c0_56 = arith.constant 0 : index
    %64 = vector.load %arg11[%c7_55, %c0_56] : memref<8x128xf32, #tpu.memory_space<vmem>>, vector<1x128xf32>
    tpu.vector_store %arg11[%c7_55, %c0_56], %63 {strides = array<i32>} : memref<8x128xf32, #tpu.memory_space<vmem>>, vector<1x128xf32>,
    %65 = arith.index_cast %61 : i32 to index
    %c0_57 = arith.constant 0 : index
    %66 = vector.load %arg10[%65, %c0_57] : memref<32x128xf32, #tpu.memory_space<vmem>>, vector<1x128xf32>
    %c7_58 = arith.constant 7 : index
    %c0_59 = arith.constant 0 : index
    %67 = vector.load %arg12[%c7_58, %c0_59] : memref<8x128xf32, #tpu.memory_space<vmem>>, vector<1x128xf32>
    tpu.vector_store %arg12[%c7_58, %c0_59], %66 {strides = array<i32>} : memref<8x128xf32, #tpu.memory_space<vmem>>, vector<1x128xf32>,
    %c0_60 = arith.constant 0 : index
    %c0_61 = arith.constant 0 : index
    %68 = vector.load %arg11[%c0_60, %c0_61] : memref<8x128xf32, #tpu.memory_space<vmem>>, vector<8x128xf32>
    %c0_62 = arith.constant 0 : index
    %c0_63 = arith.constant 0 : index
    %69 = vector.load %arg4[%c0_62, %c0_63] : memref<128x128xf32, #tpu.memory_space<vmem>>, vector<128x128xf32>
    %cst_64 = arith.constant dense<0.000000e+00> : vector<8x128xf32>
    %70 = tpu.matmul %68, %69, %cst_64 {dimension_numbers = #tpu.dot_dimension_numbers<[1], [0], [0], [1], [0, 0, 1, 1], [], []>} : vector<8x128xf32>, vector<128x128xf32>, vector<8x128xf32> -> vector<8x128xf32>
    %c0_65 = arith.constant 0 : index
    %c0_66 = arith.constant 0 : index
    %71 = vector.load %arg12[%c0_65, %c0_66] : memref<8x128xf32, #tpu.memory_space<vmem>>, vector<8x128xf32>
    %c0_67 = arith.constant 0 : index
    %c0_68 = arith.constant 0 : index
    %72 = vector.load %arg5[%c0_67, %c0_68] : memref<128x128xf32, #tpu.memory_space<vmem>>, vector<128x128xf32>
    %cst_69 = arith.constant dense<0.000000e+00> : vector<8x128xf32>
    %73 = tpu.matmul %71, %72, %cst_69 {dimension_numbers = #tpu.dot_dimension_numbers<[1], [0], [0], [1], [0, 0, 1, 1], [], []>} : vector<8x128xf32>, vector<128x128xf32>, vector<8x128xf32> -> vector<8x128xf32>
    %74 = arith.addf %70, %73 : vector<8x128xf32>
    %c0_70 = arith.constant 0 : index
    %c0_71 = arith.constant 0 : index
    %75 = vector.load %arg6[%c0_70, %c0_71] : memref<1x128xf32, #tpu.memory_space<vmem>>, vector<1x128xf32>
    %76 = vector.broadcast %75 : vector<1x128xf32> to vector<8x128xf32>
    %77 = arith.addf %74, %76 : vector<8x128xf32>
    %cst_72 = arith.constant 0.000000e+00 : f32
    %78 = vector.broadcast %cst_72 : f32 to vector<8x128xf32>
    %79 = arith.maximumf %77, %78 : vector<8x128xf32>
    %c8 = arith.constant 8 : index
    %c0_73 = arith.constant 0 : index
    %80 = vector.load %arg10[%c8, %c0_73] : memref<32x128xf32, #tpu.memory_space<vmem>>, vector<8x128xf32>
    tpu.vector_store %arg10[%c8, %c0_73], %79 {strides = array<i32>} : memref<32x128xf32, #tpu.memory_space<vmem>>, vector<8x128xf32>,
    %c8_74 = arith.constant 8 : index
    %81 = memref.load %arg1[%c8_74] : memref<24xi32, #tpu.memory_space<smem>>
    %c8_75 = arith.constant 8 : index
    %82 = memref.load %arg2[%c8_75] : memref<24xi32, #tpu.memory_space<smem>>
    %83 = arith.index_cast %81 : i32 to index
    %c0_76 = arith.constant 0 : index
    %84 = vector.load %arg10[%83, %c0_76] : memref<32x128xf32, #tpu.memory_space<vmem>>, vector<1x128xf32>
    %c0_77 = arith.constant 0 : index
    %c0_78 = arith.constant 0 : index
    %85 = vector.load %arg11[%c0_77, %c0_78] : memref<8x128xf32, #tpu.memory_space<vmem>>, vector<1x128xf32>
    tpu.vector_store %arg11[%c0_77, %c0_78], %84 {strides = array<i32>} : memref<8x128xf32, #tpu.memory_space<vmem>>, vector<1x128xf32>,
    %86 = arith.index_cast %82 : i32 to index
    %c0_79 = arith.constant 0 : index
    %87 = vector.load %arg10[%86, %c0_79] : memref<32x128xf32, #tpu.memory_space<vmem>>, vector<1x128xf32>
    %c0_80 = arith.constant 0 : index
    %c0_81 = arith.constant 0 : index
    %88 = vector.load %arg12[%c0_80, %c0_81] : memref<8x128xf32, #tpu.memory_space<vmem>>, vector<1x128xf32>
    tpu.vector_store %arg12[%c0_80, %c0_81], %87 {strides = array<i32>} : memref<8x128xf32, #tpu.memory_space<vmem>>, vector<1x128xf32>,
    %c9 = arith.constant 9 : index
    %89 = memref.load %arg1[%c9] : memref<24xi32, #tpu.memory_space<smem>>
    %c9_82 = arith.constant 9 : index
    %90 = memref.load %arg2[%c9_82] : memref<24xi32, #tpu.memory_space<smem>>
    %91 = arith.index_cast %89 : i32 to index
    %c0_83 = arith.constant 0 : index
    %92 = vector.load %arg10[%91, %c0_83] : memref<32x128xf32, #tpu.memory_space<vmem>>, vector<1x128xf32>
    %c1_84 = arith.constant 1 : index
    %c0_85 = arith.constant 0 : index
    %93 = vector.load %arg11[%c1_84, %c0_85] : memref<8x128xf32, #tpu.memory_space<vmem>>, vector<1x128xf32>
    tpu.vector_store %arg11[%c1_84, %c0_85], %92 {strides = array<i32>} : memref<8x128xf32, #tpu.memory_space<vmem>>, vector<1x128xf32>,
    %94 = arith.index_cast %90 : i32 to index
    %c0_86 = arith.constant 0 : index
    %95 = vector.load %arg10[%94, %c0_86] : memref<32x128xf32, #tpu.memory_space<vmem>>, vector<1x128xf32>
    %c1_87 = arith.constant 1 : index
    %c0_88 = arith.constant 0 : index
    %96 = vector.load %arg12[%c1_87, %c0_88] : memref<8x128xf32, #tpu.memory_space<vmem>>, vector<1x128xf32>
    tpu.vector_store %arg12[%c1_87, %c0_88], %95 {strides = array<i32>} : memref<8x128xf32, #tpu.memory_space<vmem>>, vector<1x128xf32>,
    %c10 = arith.constant 10 : index
    %97 = memref.load %arg1[%c10] : memref<24xi32, #tpu.memory_space<smem>>
    %c10_89 = arith.constant 10 : index
    %98 = memref.load %arg2[%c10_89] : memref<24xi32, #tpu.memory_space<smem>>
    %99 = arith.index_cast %97 : i32 to index
    %c0_90 = arith.constant 0 : index
    %100 = vector.load %arg10[%99, %c0_90] : memref<32x128xf32, #tpu.memory_space<vmem>>, vector<1x128xf32>
    %c2_91 = arith.constant 2 : index
    %c0_92 = arith.constant 0 : index
    %101 = vector.load %arg11[%c2_91, %c0_92] : memref<8x128xf32, #tpu.memory_space<vmem>>, vector<1x128xf32>
    tpu.vector_store %arg11[%c2_91, %c0_92], %100 {strides = array<i32>} : memref<8x128xf32, #tpu.memory_space<vmem>>, vector<1x128xf32>,
    %102 = arith.index_cast %98 : i32 to index
    %c0_93 = arith.constant 0 : index
    %103 = vector.load %arg10[%102, %c0_93] : memref<32x128xf32, #tpu.memory_space<vmem>>, vector<1x128xf32>
    %c2_94 = arith.constant 2 : index
    %c0_95 = arith.constant 0 : index
    %104 = vector.load %arg12[%c2_94, %c0_95] : memref<8x128xf32, #tpu.memory_space<vmem>>, vector<1x128xf32>
    tpu.vector_store %arg12[%c2_94, %c0_95], %103 {strides = array<i32>} : memref<8x128xf32, #tpu.memory_space<vmem>>, vector<1x128xf32>,
    %c11 = arith.constant 11 : index
    %105 = memref.load %arg1[%c11] : memref<24xi32, #tpu.memory_space<smem>>
    %c11_96 = arith.constant 11 : index
    %106 = memref.load %arg2[%c11_96] : memref<24xi32, #tpu.memory_space<smem>>
    %107 = arith.index_cast %105 : i32 to index
    %c0_97 = arith.constant 0 : index
    %108 = vector.load %arg10[%107, %c0_97] : memref<32x128xf32, #tpu.memory_space<vmem>>, vector<1x128xf32>
    %c3_98 = arith.constant 3 : index
    %c0_99 = arith.constant 0 : index
    %109 = vector.load %arg11[%c3_98, %c0_99] : memref<8x128xf32, #tpu.memory_space<vmem>>, vector<1x128xf32>
    tpu.vector_store %arg11[%c3_98, %c0_99], %108 {strides = array<i32>} : memref<8x128xf32, #tpu.memory_space<vmem>>, vector<1x128xf32>,
    %110 = arith.index_cast %106 : i32 to index
    %c0_100 = arith.constant 0 : index
    %111 = vector.load %arg10[%110, %c0_100] : memref<32x128xf32, #tpu.memory_space<vmem>>, vector<1x128xf32>
    %c3_101 = arith.constant 3 : index
    %c0_102 = arith.constant 0 : index
    %112 = vector.load %arg12[%c3_101, %c0_102] : memref<8x128xf32, #tpu.memory_space<vmem>>, vector<1x128xf32>
    tpu.vector_store %arg12[%c3_101, %c0_102], %111 {strides = array<i32>} : memref<8x128xf32, #tpu.memory_space<vmem>>, vector<1x128xf32>,
    %c12 = arith.constant 12 : index
    %113 = memref.load %arg1[%c12] : memref<24xi32, #tpu.memory_space<smem>>
    %c12_103 = arith.constant 12 : index
    %114 = memref.load %arg2[%c12_103] : memref<24xi32, #tpu.memory_space<smem>>
    %115 = arith.index_cast %113 : i32 to index
    %c0_104 = arith.constant 0 : index
    %116 = vector.load %arg10[%115, %c0_104] : memref<32x128xf32, #tpu.memory_space<vmem>>, vector<1x128xf32>
    %c4_105 = arith.constant 4 : index
    %c0_106 = arith.constant 0 : index
    %117 = vector.load %arg11[%c4_105, %c0_106] : memref<8x128xf32, #tpu.memory_space<vmem>>, vector<1x128xf32>
    tpu.vector_store %arg11[%c4_105, %c0_106], %116 {strides = array<i32>} : memref<8x128xf32, #tpu.memory_space<vmem>>, vector<1x128xf32>,
    %118 = arith.index_cast %114 : i32 to index
    %c0_107 = arith.constant 0 : index
    %119 = vector.load %arg10[%118, %c0_107] : memref<32x128xf32, #tpu.memory_space<vmem>>, vector<1x128xf32>
    %c4_108 = arith.constant 4 : index
    %c0_109 = arith.constant 0 : index
    %120 = vector.load %arg12[%c4_108, %c0_109] : memref<8x128xf32, #tpu.memory_space<vmem>>, vector<1x128xf32>
    tpu.vector_store %arg12[%c4_108, %c0_109], %119 {strides = array<i32>} : memref<8x128xf32, #tpu.memory_space<vmem>>, vector<1x128xf32>,
    %c13 = arith.constant 13 : index
    %121 = memref.load %arg1[%c13] : memref<24xi32, #tpu.memory_space<smem>>
    %c13_110 = arith.constant 13 : index
    %122 = memref.load %arg2[%c13_110] : memref<24xi32, #tpu.memory_space<smem>>
    %123 = arith.index_cast %121 : i32 to index
    %c0_111 = arith.constant 0 : index
    %124 = vector.load %arg10[%123, %c0_111] : memref<32x128xf32, #tpu.memory_space<vmem>>, vector<1x128xf32>
    %c5_112 = arith.constant 5 : index
    %c0_113 = arith.constant 0 : index
    %125 = vector.load %arg11[%c5_112, %c0_113] : memref<8x128xf32, #tpu.memory_space<vmem>>, vector<1x128xf32>
    tpu.vector_store %arg11[%c5_112, %c0_113], %124 {strides = array<i32>} : memref<8x128xf32, #tpu.memory_space<vmem>>, vector<1x128xf32>,
    %126 = arith.index_cast %122 : i32 to index
    %c0_114 = arith.constant 0 : index
    %127 = vector.load %arg10[%126, %c0_114] : memref<32x128xf32, #tpu.memory_space<vmem>>, vector<1x128xf32>
    %c5_115 = arith.constant 5 : index
    %c0_116 = arith.constant 0 : index
    %128 = vector.load %arg12[%c5_115, %c0_116] : memref<8x128xf32, #tpu.memory_space<vmem>>, vector<1x128xf32>
    tpu.vector_store %arg12[%c5_115, %c0_116], %127 {strides = array<i32>} : memref<8x128xf32, #tpu.memory_space<vmem>>, vector<1x128xf32>,
    %c14 = arith.constant 14 : index
    %129 = memref.load %arg1[%c14] : memref<24xi32, #tpu.memory_space<smem>>
    %c14_117 = arith.constant 14 : index
    %130 = memref.load %arg2[%c14_117] : memref<24xi32, #tpu.memory_space<smem>>
    %131 = arith.index_cast %129 : i32 to index
    %c0_118 = arith.constant 0 : index
    %132 = vector.load %arg10[%131, %c0_118] : memref<32x128xf32, #tpu.memory_space<vmem>>, vector<1x128xf32>
    %c6_119 = arith.constant 6 : index
    %c0_120 = arith.constant 0 : index
    %133 = vector.load %arg11[%c6_119, %c0_120] : memref<8x128xf32, #tpu.memory_space<vmem>>, vector<1x128xf32>
    tpu.vector_store %arg11[%c6_119, %c0_120], %132 {strides = array<i32>} : memref<8x128xf32, #tpu.memory_space<vmem>>, vector<1x128xf32>,
    %134 = arith.index_cast %130 : i32 to index
    %c0_121 = arith.constant 0 : index
    %135 = vector.load %arg10[%134, %c0_121] : memref<32x128xf32, #tpu.memory_space<vmem>>, vector<1x128xf32>
    %c6_122 = arith.constant 6 : index
    %c0_123 = arith.constant 0 : index
    %136 = vector.load %arg12[%c6_122, %c0_123] : memref<8x128xf32, #tpu.memory_space<vmem>>, vector<1x128xf32>
    tpu.vector_store %arg12[%c6_122, %c0_123], %135 {strides = array<i32>} : memref<8x128xf32, #tpu.memory_space<vmem>>, vector<1x128xf32>,
    %c15 = arith.constant 15 : index
    %137 = memref.load %arg1[%c15] : memref<24xi32, #tpu.memory_space<smem>>
    %c15_124 = arith.constant 15 : index
    %138 = memref.load %arg2[%c15_124] : memref<24xi32, #tpu.memory_space<smem>>
    %139 = arith.index_cast %137 : i32 to index
    %c0_125 = arith.constant 0 : index
    %140 = vector.load %arg10[%139, %c0_125] : memref<32x128xf32, #tpu.memory_space<vmem>>, vector<1x128xf32>
    %c7_126 = arith.constant 7 : index
    %c0_127 = arith.constant 0 : index
    %141 = vector.load %arg11[%c7_126, %c0_127] : memref<8x128xf32, #tpu.memory_space<vmem>>, vector<1x128xf32>
    tpu.vector_store %arg11[%c7_126, %c0_127], %140 {strides = array<i32>} : memref<8x128xf32, #tpu.memory_space<vmem>>, vector<1x128xf32>,
    %142 = arith.index_cast %138 : i32 to index
    %c0_128 = arith.constant 0 : index
    %143 = vector.load %arg10[%142, %c0_128] : memref<32x128xf32, #tpu.memory_space<vmem>>, vector<1x128xf32>
    %c7_129 = arith.constant 7 : index
    %c0_130 = arith.constant 0 : index
    %144 = vector.load %arg12[%c7_129, %c0_130] : memref<8x128xf32, #tpu.memory_space<vmem>>, vector<1x128xf32>
    tpu.vector_store %arg12[%c7_129, %c0_130], %143 {strides = array<i32>} : memref<8x128xf32, #tpu.memory_space<vmem>>, vector<1x128xf32>,
    %c0_131 = arith.constant 0 : index
    %c0_132 = arith.constant 0 : index
    %145 = vector.load %arg11[%c0_131, %c0_132] : memref<8x128xf32, #tpu.memory_space<vmem>>, vector<8x128xf32>
    %c0_133 = arith.constant 0 : index
    %c0_134 = arith.constant 0 : index
    %146 = vector.load %arg4[%c0_133, %c0_134] : memref<128x128xf32, #tpu.memory_space<vmem>>, vector<128x128xf32>
    %cst_135 = arith.constant dense<0.000000e+00> : vector<8x128xf32>
    %147 = tpu.matmul %145, %146, %cst_135 {dimension_numbers = #tpu.dot_dimension_numbers<[1], [0], [0], [1], [0, 0, 1, 1], [], []>} : vector<8x128xf32>, vector<128x128xf32>, vector<8x128xf32> -> vector<8x128xf32>
    %c0_136 = arith.constant 0 : index
    %c0_137 = arith.constant 0 : index
    %148 = vector.load %arg12[%c0_136, %c0_137] : memref<8x128xf32, #tpu.memory_space<vmem>>, vector<8x128xf32>
    %c0_138 = arith.constant 0 : index
    %c0_139 = arith.constant 0 : index
    %149 = vector.load %arg5[%c0_138, %c0_139] : memref<128x128xf32, #tpu.memory_space<vmem>>, vector<128x128xf32>
    %cst_140 = arith.constant dense<0.000000e+00> : vector<8x128xf32>
    %150 = tpu.matmul %148, %149, %cst_140 {dimension_numbers = #tpu.dot_dimension_numbers<[1], [0], [0], [1], [0, 0, 1, 1], [], []>} : vector<8x128xf32>, vector<128x128xf32>, vector<8x128xf32> -> vector<8x128xf32>
    %151 = arith.addf %147, %150 : vector<8x128xf32>
    %c0_141 = arith.constant 0 : index
    %c0_142 = arith.constant 0 : index
    %152 = vector.load %arg6[%c0_141, %c0_142] : memref<1x128xf32, #tpu.memory_space<vmem>>, vector<1x128xf32>
    %153 = vector.broadcast %152 : vector<1x128xf32> to vector<8x128xf32>
    %154 = arith.addf %151, %153 : vector<8x128xf32>
    %cst_143 = arith.constant 0.000000e+00 : f32
    %155 = vector.broadcast %cst_143 : f32 to vector<8x128xf32>
    %156 = arith.maximumf %154, %155 : vector<8x128xf32>
    %c16 = arith.constant 16 : index
    %c0_144 = arith.constant 0 : index
    %157 = vector.load %arg10[%c16, %c0_144] : memref<32x128xf32, #tpu.memory_space<vmem>>, vector<8x128xf32>
    tpu.vector_store %arg10[%c16, %c0_144], %156 {strides = array<i32>} : memref<32x128xf32, #tpu.memory_space<vmem>>, vector<8x128xf32>,
    %c16_145 = arith.constant 16 : index
    %158 = memref.load %arg1[%c16_145] : memref<24xi32, #tpu.memory_space<smem>>
    %c16_146 = arith.constant 16 : index
    %159 = memref.load %arg2[%c16_146] : memref<24xi32, #tpu.memory_space<smem>>
    %160 = arith.index_cast %158 : i32 to index
    %c0_147 = arith.constant 0 : index
    %161 = vector.load %arg10[%160, %c0_147] : memref<32x128xf32, #tpu.memory_space<vmem>>, vector<1x128xf32>
    %c0_148 = arith.constant 0 : index
    %c0_149 = arith.constant 0 : index
    %162 = vector.load %arg11[%c0_148, %c0_149] : memref<8x128xf32, #tpu.memory_space<vmem>>, vector<1x128xf32>
    tpu.vector_store %arg11[%c0_148, %c0_149], %161 {strides = array<i32>} : memref<8x128xf32, #tpu.memory_space<vmem>>, vector<1x128xf32>,
    %163 = arith.index_cast %159 : i32 to index
    %c0_150 = arith.constant 0 : index
    %164 = vector.load %arg10[%163, %c0_150] : memref<32x128xf32, #tpu.memory_space<vmem>>, vector<1x128xf32>
    %c0_151 = arith.constant 0 : index
    %c0_152 = arith.constant 0 : index
    %165 = vector.load %arg12[%c0_151, %c0_152] : memref<8x128xf32, #tpu.memory_space<vmem>>, vector<1x128xf32>
    tpu.vector_store %arg12[%c0_151, %c0_152], %164 {strides = array<i32>} : memref<8x128xf32, #tpu.memory_space<vmem>>, vector<1x128xf32>,
    %c17 = arith.constant 17 : index
    %166 = memref.load %arg1[%c17] : memref<24xi32, #tpu.memory_space<smem>>
    %c17_153 = arith.constant 17 : index
    %167 = memref.load %arg2[%c17_153] : memref<24xi32, #tpu.memory_space<smem>>
    %168 = arith.index_cast %166 : i32 to index
    %c0_154 = arith.constant 0 : index
    %169 = vector.load %arg10[%168, %c0_154] : memref<32x128xf32, #tpu.memory_space<vmem>>, vector<1x128xf32>
    %c1_155 = arith.constant 1 : index
    %c0_156 = arith.constant 0 : index
    %170 = vector.load %arg11[%c1_155, %c0_156] : memref<8x128xf32, #tpu.memory_space<vmem>>, vector<1x128xf32>
    tpu.vector_store %arg11[%c1_155, %c0_156], %169 {strides = array<i32>} : memref<8x128xf32, #tpu.memory_space<vmem>>, vector<1x128xf32>,
    %171 = arith.index_cast %167 : i32 to index
    %c0_157 = arith.constant 0 : index
    %172 = vector.load %arg10[%171, %c0_157] : memref<32x128xf32, #tpu.memory_space<vmem>>, vector<1x128xf32>
    %c1_158 = arith.constant 1 : index
    %c0_159 = arith.constant 0 : index
    %173 = vector.load %arg12[%c1_158, %c0_159] : memref<8x128xf32, #tpu.memory_space<vmem>>, vector<1x128xf32>
    tpu.vector_store %arg12[%c1_158, %c0_159], %172 {strides = array<i32>} : memref<8x128xf32, #tpu.memory_space<vmem>>, vector<1x128xf32>,
    %c18 = arith.constant 18 : index
    %174 = memref.load %arg1[%c18] : memref<24xi32, #tpu.memory_space<smem>>
    %c18_160 = arith.constant 18 : index
    %175 = memref.load %arg2[%c18_160] : memref<24xi32, #tpu.memory_space<smem>>
    %176 = arith.index_cast %174 : i32 to index
    %c0_161 = arith.constant 0 : index
    %177 = vector.load %arg10[%176, %c0_161] : memref<32x128xf32, #tpu.memory_space<vmem>>, vector<1x128xf32>
    %c2_162 = arith.constant 2 : index
    %c0_163 = arith.constant 0 : index
    %178 = vector.load %arg11[%c2_162, %c0_163] : memref<8x128xf32, #tpu.memory_space<vmem>>, vector<1x128xf32>
    tpu.vector_store %arg11[%c2_162, %c0_163], %177 {strides = array<i32>} : memref<8x128xf32, #tpu.memory_space<vmem>>, vector<1x128xf32>,
    %179 = arith.index_cast %175 : i32 to index
    %c0_164 = arith.constant 0 : index
    %180 = vector.load %arg10[%179, %c0_164] : memref<32x128xf32, #tpu.memory_space<vmem>>, vector<1x128xf32>
    %c2_165 = arith.constant 2 : index
    %c0_166 = arith.constant 0 : index
    %181 = vector.load %arg12[%c2_165, %c0_166] : memref<8x128xf32, #tpu.memory_space<vmem>>, vector<1x128xf32>
    tpu.vector_store %arg12[%c2_165, %c0_166], %180 {strides = array<i32>} : memref<8x128xf32, #tpu.memory_space<vmem>>, vector<1x128xf32>,
    %c19 = arith.constant 19 : index
    %182 = memref.load %arg1[%c19] : memref<24xi32, #tpu.memory_space<smem>>
    %c19_167 = arith.constant 19 : index
    %183 = memref.load %arg2[%c19_167] : memref<24xi32, #tpu.memory_space<smem>>
    %184 = arith.index_cast %182 : i32 to index
    %c0_168 = arith.constant 0 : index
    %185 = vector.load %arg10[%184, %c0_168] : memref<32x128xf32, #tpu.memory_space<vmem>>, vector<1x128xf32>
    %c3_169 = arith.constant 3 : index
    %c0_170 = arith.constant 0 : index
    %186 = vector.load %arg11[%c3_169, %c0_170] : memref<8x128xf32, #tpu.memory_space<vmem>>, vector<1x128xf32>
    tpu.vector_store %arg11[%c3_169, %c0_170], %185 {strides = array<i32>} : memref<8x128xf32, #tpu.memory_space<vmem>>, vector<1x128xf32>,
    %187 = arith.index_cast %183 : i32 to index
    %c0_171 = arith.constant 0 : index
    %188 = vector.load %arg10[%187, %c0_171] : memref<32x128xf32, #tpu.memory_space<vmem>>, vector<1x128xf32>
    %c3_172 = arith.constant 3 : index
    %c0_173 = arith.constant 0 : index
    %189 = vector.load %arg12[%c3_172, %c0_173] : memref<8x128xf32, #tpu.memory_space<vmem>>, vector<1x128xf32>
    tpu.vector_store %arg12[%c3_172, %c0_173], %188 {strides = array<i32>} : memref<8x128xf32, #tpu.memory_space<vmem>>, vector<1x128xf32>,
    %c20 = arith.constant 20 : index
    %190 = memref.load %arg1[%c20] : memref<24xi32, #tpu.memory_space<smem>>
    %c20_174 = arith.constant 20 : index
    %191 = memref.load %arg2[%c20_174] : memref<24xi32, #tpu.memory_space<smem>>
    %192 = arith.index_cast %190 : i32 to index
    %c0_175 = arith.constant 0 : index
    %193 = vector.load %arg10[%192, %c0_175] : memref<32x128xf32, #tpu.memory_space<vmem>>, vector<1x128xf32>
    %c4_176 = arith.constant 4 : index
    %c0_177 = arith.constant 0 : index
    %194 = vector.load %arg11[%c4_176, %c0_177] : memref<8x128xf32, #tpu.memory_space<vmem>>, vector<1x128xf32>
    tpu.vector_store %arg11[%c4_176, %c0_177], %193 {strides = array<i32>} : memref<8x128xf32, #tpu.memory_space<vmem>>, vector<1x128xf32>,
    %195 = arith.index_cast %191 : i32 to index
    %c0_178 = arith.constant 0 : index
    %196 = vector.load %arg10[%195, %c0_178] : memref<32x128xf32, #tpu.memory_space<vmem>>, vector<1x128xf32>
    %c4_179 = arith.constant 4 : index
    %c0_180 = arith.constant 0 : index
    %197 = vector.load %arg12[%c4_179, %c0_180] : memref<8x128xf32, #tpu.memory_space<vmem>>, vector<1x128xf32>
    tpu.vector_store %arg12[%c4_179, %c0_180], %196 {strides = array<i32>} : memref<8x128xf32, #tpu.memory_space<vmem>>, vector<1x128xf32>,
    %c21 = arith.constant 21 : index
    %198 = memref.load %arg1[%c21] : memref<24xi32, #tpu.memory_space<smem>>
    %c21_181 = arith.constant 21 : index
    %199 = memref.load %arg2[%c21_181] : memref<24xi32, #tpu.memory_space<smem>>
    %200 = arith.index_cast %198 : i32 to index
    %c0_182 = arith.constant 0 : index
    %201 = vector.load %arg10[%200, %c0_182] : memref<32x128xf32, #tpu.memory_space<vmem>>, vector<1x128xf32>
    %c5_183 = arith.constant 5 : index
    %c0_184 = arith.constant 0 : index
    %202 = vector.load %arg11[%c5_183, %c0_184] : memref<8x128xf32, #tpu.memory_space<vmem>>, vector<1x128xf32>
    tpu.vector_store %arg11[%c5_183, %c0_184], %201 {strides = array<i32>} : memref<8x128xf32, #tpu.memory_space<vmem>>, vector<1x128xf32>,
    %203 = arith.index_cast %199 : i32 to index
    %c0_185 = arith.constant 0 : index
    %204 = vector.load %arg10[%203, %c0_185] : memref<32x128xf32, #tpu.memory_space<vmem>>, vector<1x128xf32>
    %c5_186 = arith.constant 5 : index
    %c0_187 = arith.constant 0 : index
    %205 = vector.load %arg12[%c5_186, %c0_187] : memref<8x128xf32, #tpu.memory_space<vmem>>, vector<1x128xf32>
    tpu.vector_store %arg12[%c5_186, %c0_187], %204 {strides = array<i32>} : memref<8x128xf32, #tpu.memory_space<vmem>>, vector<1x128xf32>,
    %c22 = arith.constant 22 : index
    %206 = memref.load %arg1[%c22] : memref<24xi32, #tpu.memory_space<smem>>
    %c22_188 = arith.constant 22 : index
    %207 = memref.load %arg2[%c22_188] : memref<24xi32, #tpu.memory_space<smem>>
    %208 = arith.index_cast %206 : i32 to index
    %c0_189 = arith.constant 0 : index
    %209 = vector.load %arg10[%208, %c0_189] : memref<32x128xf32, #tpu.memory_space<vmem>>, vector<1x128xf32>
    %c6_190 = arith.constant 6 : index
    %c0_191 = arith.constant 0 : index
    %210 = vector.load %arg11[%c6_190, %c0_191] : memref<8x128xf32, #tpu.memory_space<vmem>>, vector<1x128xf32>
    tpu.vector_store %arg11[%c6_190, %c0_191], %209 {strides = array<i32>} : memref<8x128xf32, #tpu.memory_space<vmem>>, vector<1x128xf32>,
    %211 = arith.index_cast %207 : i32 to index
    %c0_192 = arith.constant 0 : index
    %212 = vector.load %arg10[%211, %c0_192] : memref<32x128xf32, #tpu.memory_space<vmem>>, vector<1x128xf32>
    %c6_193 = arith.constant 6 : index
    %c0_194 = arith.constant 0 : index
    %213 = vector.load %arg12[%c6_193, %c0_194] : memref<8x128xf32, #tpu.memory_space<vmem>>, vector<1x128xf32>
    tpu.vector_store %arg12[%c6_193, %c0_194], %212 {strides = array<i32>} : memref<8x128xf32, #tpu.memory_space<vmem>>, vector<1x128xf32>,
    %c23 = arith.constant 23 : index
    %214 = memref.load %arg1[%c23] : memref<24xi32, #tpu.memory_space<smem>>
    %c23_195 = arith.constant 23 : index
    %215 = memref.load %arg2[%c23_195] : memref<24xi32, #tpu.memory_space<smem>>
    %216 = arith.index_cast %214 : i32 to index
    %c0_196 = arith.constant 0 : index
    %217 = vector.load %arg10[%216, %c0_196] : memref<32x128xf32, #tpu.memory_space<vmem>>, vector<1x128xf32>
    %c7_197 = arith.constant 7 : index
    %c0_198 = arith.constant 0 : index
    %218 = vector.load %arg11[%c7_197, %c0_198] : memref<8x128xf32, #tpu.memory_space<vmem>>, vector<1x128xf32>
    tpu.vector_store %arg11[%c7_197, %c0_198], %217 {strides = array<i32>} : memref<8x128xf32, #tpu.memory_space<vmem>>, vector<1x128xf32>,
    %219 = arith.index_cast %215 : i32 to index
    %c0_199 = arith.constant 0 : index
    %220 = vector.load %arg10[%219, %c0_199] : memref<32x128xf32, #tpu.memory_space<vmem>>, vector<1x128xf32>
    %c7_200 = arith.constant 7 : index
    %c0_201 = arith.constant 0 : index
    %221 = vector.load %arg12[%c7_200, %c0_201] : memref<8x128xf32, #tpu.memory_space<vmem>>, vector<1x128xf32>
    tpu.vector_store %arg12[%c7_200, %c0_201], %220 {strides = array<i32>} : memref<8x128xf32, #tpu.memory_space<vmem>>, vector<1x128xf32>,
    %c0_202 = arith.constant 0 : index
    %c0_203 = arith.constant 0 : index
    %222 = vector.load %arg11[%c0_202, %c0_203] : memref<8x128xf32, #tpu.memory_space<vmem>>, vector<8x128xf32>
    %c0_204 = arith.constant 0 : index
    %c0_205 = arith.constant 0 : index
    %223 = vector.load %arg4[%c0_204, %c0_205] : memref<128x128xf32, #tpu.memory_space<vmem>>, vector<128x128xf32>
    %cst_206 = arith.constant dense<0.000000e+00> : vector<8x128xf32>
    %224 = tpu.matmul %222, %223, %cst_206 {dimension_numbers = #tpu.dot_dimension_numbers<[1], [0], [0], [1], [0, 0, 1, 1], [], []>} : vector<8x128xf32>, vector<128x128xf32>, vector<8x128xf32> -> vector<8x128xf32>
    %c0_207 = arith.constant 0 : index
    %c0_208 = arith.constant 0 : index
    %225 = vector.load %arg12[%c0_207, %c0_208] : memref<8x128xf32, #tpu.memory_space<vmem>>, vector<8x128xf32>
    %c0_209 = arith.constant 0 : index
    %c0_210 = arith.constant 0 : index
    %226 = vector.load %arg5[%c0_209, %c0_210] : memref<128x128xf32, #tpu.memory_space<vmem>>, vector<128x128xf32>
    %cst_211 = arith.constant dense<0.000000e+00> : vector<8x128xf32>
    %227 = tpu.matmul %225, %226, %cst_211 {dimension_numbers = #tpu.dot_dimension_numbers<[1], [0], [0], [1], [0, 0, 1, 1], [], []>} : vector<8x128xf32>, vector<128x128xf32>, vector<8x128xf32> -> vector<8x128xf32>
    %228 = arith.addf %224, %227 : vector<8x128xf32>
    %c0_212 = arith.constant 0 : index
    %c0_213 = arith.constant 0 : index
    %229 = vector.load %arg6[%c0_212, %c0_213] : memref<1x128xf32, #tpu.memory_space<vmem>>, vector<1x128xf32>
    %230 = vector.broadcast %229 : vector<1x128xf32> to vector<8x128xf32>
    %231 = arith.addf %228, %230 : vector<8x128xf32>
    %cst_214 = arith.constant 0.000000e+00 : f32
    %232 = vector.broadcast %cst_214 : f32 to vector<8x128xf32>
    %233 = arith.maximumf %231, %232 : vector<8x128xf32>
    %c24 = arith.constant 24 : index
    %c0_215 = arith.constant 0 : index
    %234 = vector.load %arg10[%c24, %c0_215] : memref<32x128xf32, #tpu.memory_space<vmem>>, vector<8x128xf32>
    tpu.vector_store %arg10[%c24, %c0_215], %233 {strides = array<i32>} : memref<32x128xf32, #tpu.memory_space<vmem>>, vector<8x128xf32>,
    %c0_216 = arith.constant 0 : index
    %c0_217 = arith.constant 0 : index
    %235 = vector.load %arg10[%c0_216, %c0_217] : memref<32x128xf32, #tpu.memory_space<vmem>>, vector<32x128xf32>
    %c0_218 = arith.constant 0 : index
    %c0_219 = arith.constant 0 : index
    %236 = vector.load %arg7[%c0_218, %c0_219] : memref<128x128xf32, #tpu.memory_space<vmem>>, vector<128x128xf32>
    %cst_220 = arith.constant dense<0.000000e+00> : vector<32x128xf32>
    %237 = tpu.matmul %235, %236, %cst_220 {dimension_numbers = #tpu.dot_dimension_numbers<[1], [0], [0], [1], [0, 0, 1, 1], [], []>} : vector<32x128xf32>, vector<128x128xf32>, vector<32x128xf32> -> vector<32x128xf32>
    %c0_221 = arith.constant 0 : index
    %c0_222 = arith.constant 0 : index
    %238 = vector.load %arg8[%c0_221, %c0_222] : memref<1x128xf32, #tpu.memory_space<vmem>>, vector<1x128xf32>
    %239 = vector.broadcast %238 : vector<1x128xf32> to vector<32x128xf32>
    %240 = arith.addf %237, %239 : vector<32x128xf32>
    %c0_223 = arith.constant 0 : index
    %c0_224 = arith.constant 0 : index
    %241 = vector.load %arg9[%c0_223, %c0_224] : memref<32x128xf32, #tpu.memory_space<vmem>>, vector<32x128xf32>
    tpu.vector_store %arg9[%c0_223, %c0_224], %240 {strides = array<i32>} : memref<32x128xf32, #tpu.memory_space<vmem>>, vector<32x128xf32>,
    return
  }
  func.func @transform_0(%arg0: i32, %arg1: memref<24xi32, #tpu.memory_space<smem>>, %arg2: memref<24xi32, #tpu.memory_space<smem>>) -> (i32, i32) {
    %c0_i32 = arith.constant 0 : i32
    %c0_i32_0 = arith.constant 0 : i32
    %c0_i32_1 = arith.constant 0 : i32
    return %c0_i32, %c0_i32_0 : i32, i32
  }
  func.func @transform_1(%arg0: i32, %arg1: memref<24xi32, #tpu.memory_space<smem>>, %arg2: memref<24xi32, #tpu.memory_space<smem>>) -> (i32, i32) {
    %c0_i32 = arith.constant 0 : i32
    %c0_i32_0 = arith.constant 0 : i32
    %c0_i32_1 = arith.constant 0 : i32
    return %c0_i32, %c0_i32_0 : i32, i32
  }
  func.func @transform_2(%arg0: i32, %arg1: memref<24xi32, #tpu.memory_space<smem>>, %arg2: memref<24xi32, #tpu.memory_space<smem>>) -> (i32, i32) {
    %c0_i32 = arith.constant 0 : i32
    %c0_i32_0 = arith.constant 0 : i32
    %c0_i32_1 = arith.constant 0 : i32
    return %c0_i32, %c0_i32_0 : i32, i32
  }
  func.func @transform_3(%arg0: i32, %arg1: memref<24xi32, #tpu.memory_space<smem>>, %arg2: memref<24xi32, #tpu.memory_space<smem>>) -> (i32, i32) {
    %c0_i32 = arith.constant 0 : i32
    %c0_i32_0 = arith.constant 0 : i32
    %c0_i32_1 = arith.constant 0 : i32
    return %c0_i32, %c0_i32_0 : i32, i32
  }
  func.func @transform_4(%arg0: i32, %arg1: memref<24xi32, #tpu.memory_space<smem>>, %arg2: memref<24xi32, #tpu.memory_space<smem>>) -> (i32, i32) {
    %c0_i32 = arith.constant 0 : i32
    %c0_i32_0 = arith.constant 0 : i32
    %c0_i32_1 = arith.constant 0 : i32
    return %c0_i32, %c0_i32_0 : i32, i32
  }
  func.func @transform_5(%arg0: i32, %arg1: memref<24xi32, #tpu.memory_space<smem>>, %arg2: memref<24xi32, #tpu.memory_space<smem>>) -> (i32, i32) {
    %c0_i32 = arith.constant 0 : i32
    %c0_i32_0 = arith.constant 0 : i32
    %c0_i32_1 = arith.constant 0 : i32
    return %c0_i32, %c0_i32_0 : i32, i32
  }
  func.func @transform_6(%arg0: i32, %arg1: memref<24xi32, #tpu.memory_space<smem>>, %arg2: memref<24xi32, #tpu.memory_space<smem>>) -> (i32, i32) {
    %c0_i32 = arith.constant 0 : i32
    %c0_i32_0 = arith.constant 0 : i32
    %c0_i32_1 = arith.constant 0 : i32
    return %c0_i32, %c0_i32_0 : i32, i32
  }
}

</mosaic_0001>

<bundles_post_ra>
// kernel: tpu_custom_call.1
= control target key start
LH: loop header
LB: loop body
LE: loop exit
PB: predicated region body
PF: predicated region fallthrough
CT: control target
= control target key end

     0   :  { %s2213_s0 = inlined_call_operand.hbm [shape: s32[24], index: 0, kind: input, shape index: {}]   ;;  %s2214_s2 = inlined_call_operand.hbm [shape: f32[8,128], index: 2, kind: input, shape index: {}]   ;;  %s2215_s3 = inlined_call_operand.hbm [shape: f32[128,128], index: 3, kind: input, shape index: {}]   ;;  %s2216_s4 = inlined_call_operand.hbm [shape: f32[128,128], index: 4, kind: input, shape index: {}]   ;;  %s2217_s5 = inlined_call_operand.vmem [shape: f32[1,128], index: 5, kind: input, shape index: {}]   ;;  %s2218_s6 = inlined_call_operand.hbm [shape: f32[128,128], index: 6, kind: input, shape index: {}]   ;;  %s2219_s7 = inlined_call_operand.vmem [shape: f32[1,128], index: 7, kind: input, shape index: {}]   ;;  %s2220_s8 = inlined_call_operand.hbm [shape: f32[32,128], index: 8, kind: output, shape index: {}]   ;;  %s2221_s1 = inlined_call_operand.vmem [shape: s32[24], index: 1, kind: input, shape index: {}]  }
   0x1   :  { %s1625_s29 = scalar_lea.hbm %s2213_s0, 16 }
   0x2   :  { %p1626_p0 = scmp.ne.s32.totalorder %s2213_s0, %s1625_s29  ;;  %p1629_p1 = scmp.lt.u32.totalorder %s1625_s29, %s2213_s0 }
   0x4   :  { %p1631_p2 = pnand %p1629_p1, %p1626_p0 }
   0x6   :  { %1634 = shalt.err (!%p1631_p2)  }
   0x7   :  { %s1767_s12 = smov [#allocation6]   ;;  %s15_s17 = sshll.u32 %s2221_s1, 4  ;;  %s16_s17 = int_to_ptr.vmem [resolvable:$true] %s15_s17 }
   0x8   :  { %14 = dma.hbm_to_smem %s2213_s0, 16, %s1767_s12, [#allocation5] }
   0x9   :  { %s1635_s18 = scalar_lea.vmem %s16_s17, 16  ;;  %p1640_p4 = scmp.lt.s32.totalorder %s16_s17, %s16_s17 }
   0xa   :  { %p1636_p3 = scmp.ne.s32.totalorder %s16_s17, %s1635_s18  ;;  %p1641_p5 = scmp.lt.s32.totalorder %s1635_s18, %s1635_s18 }
   0xc   :  { %p1642_p6 = por %p1641_p5, %p1640_p4 }
   0xe   :  { %p1643_p7 = pnand %p1642_p6, %p1636_p3 }
  0x10   :  { %1646 = shalt.err (!%p1643_p7)  }
  0x11   :  { %s1768_s19 = smov [#allocation7]  }
  0x12   :  { %18 = dma.vmem_to_smem %s16_s17, 16, %s1768_s19, [#allocation5] }
  0x13   :  { %1757 = dma.done.wait [#allocation5], 32 }
  0x14   :  { %1758 = vsyncadd [#allocation5], 4294967264 }
  0x15   :  { %20 = sfence }
  0x16   :  { %21 = vsyncpa [#allocation9], 0 }
  0x17   :  { %22 = vsyncpa [#allocation12], 0 }
  0x18   :  { %23 = vsyncpa [#allocation15], 0 }
  0x19   :  { %24 = vsyncpa [#allocation10], 0  ;;  %s1769_s0 = smov [#allocation11]   ;;  %s1647_s22 = scalar_lea.hbm %s2215_s3, 2048 }
  0x1a   :  { %s40_s20 = sshll.u32 %s1769_s0, 4  ;;  %p1648_p8 = scmp.ne.s32.totalorder %s2215_s3, %s1647_s22  ;;  %s41_s20 = int_to_ptr.vmem [resolvable:$true] %s40_s20 }
  0x1b   :  { %p1651_p9 = scmp.lt.u32.totalorder %s1647_s22, %s2215_s3 }
  0x1d   :  { %p1653_p10 = pnand %p1651_p9, %p1648_p8 }
  0x1f   :  { %1656 = shalt.err (!%p1653_p10)
}
  0x20   :  { %s1657_s27 = scalar_lea.vmem %s41_s20, 2048  ;;  %p1662_p12 = scmp.lt.s32.totalorder %s41_s20, %s41_s20 }
  0x21   :  { %p1658_p11 = scmp.ne.s32.totalorder %s41_s20, %s1657_s27  ;;  %p1663_p13 = scmp.lt.s32.totalorder %s1657_s27, %s1657_s27 }
  0x23   :  { %p1664_p0 = por %p1663_p13, %p1662_p12 }
  0x25   :  { %p1665_p1 = pnand %p1664_p0, %p1658_p11 }
  0x27   :  { %1668 = shalt.err (!%p1665_p1)
}
  0x28   :  { %s1770_s28 = smov 128   ;;  %s1771_s29 = smov 8  }
  0x29   :  { %46 = dma.hbm_to_vmem [thread:$0]  %s2215_s3, 2048, %s41_s20, [#allocation12], %s1770_s28, %s1770_s28, %s1771_s29  }
  0x2a   :  { %s1772_s10 = smov [#allocation8]   ;;  %s1773_s12 = smov [#allocation13]  }
  0x2b   :  { %s31_s11 = sshll.u32 %s1772_s10, 4  ;;  %s52_s13 = sshll.u32 %s1773_s12, 4  ;;  %s32_s11 = int_to_ptr.vmem [resolvable:$true] %s31_s11  ;;  %s53_s13 = int_to_ptr.vmem [resolvable:$true] %s52_s13 }
  0x2c   :  { %s1669_s16 = scalar_lea.hbm %s2214_s2, 128 }
  0x2d   :  { %p1670_p2 = scmp.ne.s32.totalorder %s2214_s2, %s1669_s16  ;;  %p1673_p3 = scmp.lt.u32.totalorder %s1669_s16, %s2214_s2 }
  0x2f   :  { %p1675_p4 = pnand %p1673_p3, %p1670_p2 }
  0x31   :  { %1678 = shalt.err (!%p1675_p4)
}
  0x32   :  { %s1679_s3 = scalar_lea.vmem %s32_s11, 128  ;;  %p1684_p6 = scmp.lt.s32.totalorder %s32_s11, %s32_s11 }
  0x33   :  { %p1680_p5 = scmp.ne.s32.totalorder %s32_s11, %s1679_s3  ;;  %p1685_p7 = scmp.lt.s32.totalorder %s1679_s3, %s1679_s3 }
  0x35   :  { %p1686_p8 = por %p1685_p7, %p1684_p6 }
  0x37   :  { %p1687_p9 = pnand %p1686_p8, %p1680_p5 }
  0x39   :  { %1690 = shalt.err (!%p1687_p9)
}
  0x3a   :  { %34 = dma.hbm_to_vmem [thread:$0]  %s2214_s2, 128, %s32_s11, [#allocation9]  }
  0x3b   :  { %s1691_s23 = scalar_lea.hbm %s2216_s4, 2048 }
  0x3c   :  { %p1692_p10 = scmp.ne.s32.totalorder %s2216_s4, %s1691_s23  ;;  %p1695_p11 = scmp.lt.u32.totalorder %s1691_s23, %s2216_s4 }
  0x3e   :  { %p1697_p12 = pnand %p1695_p11, %p1692_p10 }
  0x40   :  { %1700 = shalt.err (!%p1697_p12)
}
  0x41   :  { %s1701_s30 = scalar_lea.vmem %s53_s13, 2048  ;;  %p1706_p0 = scmp.lt.s32.totalorder %s53_s13, %s53_s13 }
  0x42   :  { %p1702_p13 = scmp.ne.s32.totalorder %s53_s13, %s1701_s30  ;;  %p1707_p1 = scmp.lt.s32.totalorder %s1701_s30, %s1701_s30 }
  0x44   :  { %p1708_p2 = por %p1707_p1, %p1706_p0 }
  0x46   :  { %p1709_p3 = pnand %p1708_p2, %p1702_p13 }
  0x48   :  { %1712 = shalt.err (!%p1709_p3)
}
  0x49   :  { %58 = dma.hbm_to_vmem [thread:$0]  %s2216_s4, 2048, %s53_s13, [#allocation12], %s1770_s28, %s1770_s28, %s1771_s29  }
  0x4a   :  { %s1774_s10 = smov [#allocation14]   ;;  %s1713_s15 = scalar_lea.hbm %s2218_s6, 2048 }
  0x4b   :  { %s66_s11 = sshll.u32 %s1774_s10, 4  ;;  %p1714_p4 = scmp.ne.s32.totalorder %s2218_s6, %s1713_s15  ;;  %s67_s11 = int_to_ptr.vmem [resolvable:$true] %s66_s11 }
  0x4c   :  { %p1717_p5 = scmp.lt.u32.totalorder %s1713_s15, %s2218_s6 }
  0x4e   :  { %p1719_p6 = pnand %p1717_p5, %p1714_p4 }
  0x50   :  { %1722 = shalt.err (!%p1719_p6)
}
  0x51   :  { %s1723_s0 = scalar_lea.vmem %s67_s11, 2048  ;;  %p1728_p8 = scmp.lt.s32.totalorder %s67_s11, %s67_s11 }
  0x52   :  { %p1724_p7 = scmp.ne.s32.totalorder %s67_s11, %s1723_s0  ;;  %p1729_p9 = scmp.lt.s32.totalorder %s1723_s0, %s1723_s0 }
  0x54   :  { %p1730_p10 = por %p1729_p9, %p1728_p8 }
  0x56   :  { %p1731_p11 = pnand %p1730_p10, %p1724_p7 }
  0x58   :  { %1734 = shalt.err (!%p1731_p11)
}
  0x59   :  { %72 = dma.hbm_to_vmem [thread:$0]  %s2218_s6, 2048, %s67_s11, [#allocation15], %s1770_s28, %s1770_s28, %s1771_s29  }
  0x5a   :  { %1759 = dma.done.wait [#allocation9], 128  }
  0x5b   :  { %1760 = vsyncadd [#allocation9], 4294967168 }
  0x5c   :  { %1761 = dma.done.wait [#allocation12], 4096  }
  0x5d   :  { %1762 = vsyncadd [#allocation12], 4294963200 }
  0x5e   :  { %1763 = dma.done.wait [#allocation15], 2048  }
  0x5f   :  { %1764 = vsyncadd [#allocation15], 4294965248  ;;  %v1775_v0 = vmov 0.0|0.0   ;;  %vm1776_vm0 = vmmov 0   ;;  %v1777_v1 = vmov 0.0   ;;  %s1902_s6 = sld [smem:[#allocation7]] }
  0x60   :  { %1437 = vmatprep.subr.bf16.mxu1 %v1775_v0  ;;  %1221 = vmatprep.mubr.msk.f32.mxu1 %vm1776_vm0, %v1777_v1  ;;  %s1904_s3 = sld [smem:[#allocation7 + $0x1]]  ;;  %s1906_s20 = sld [smem:[#allocation7 + $0x2]]  ;;  %v172_v2 = vld [vmem:[#allocation13] sm:$0xff]  ;;  %v173_v3 = vld [vmem:[#allocation13 + $0x8] sm:$0xff]  ;;  %v174_v4 = vld [vmem:[#allocation13 + $0x10] sm:$0xff] }
  0x61   :  { %1485 = vmatprep.subr.bf16.mxu0 %v1775_v0  ;;  %1291 = vmatprep.mubr.msk.f32.mxu0 %vm1776_vm0, %v1777_v1  ;;  %s1908_s1 = sld [smem:[#allocation7 + $0x3]]  ;;  %v1910_v5 = vpack.c.bf16 %v173_v3, %v172_v2  ;;  %v175_v6 = vld [vmem:[#allocation13 + $0x18] sm:$0xff]  ;;  %s1912_s21 = sld [smem:[#allocation7 + $0x4]]  ;;  %v176_v8 = vld [vmem:[#allocation13 + $0x20] sm:$0xff]  ;;  %v177_v9 = vld [vmem:[#allocation13 + $0x28] sm:$0xff] }
  0x62   :  { %s1914_s22 = sld [smem:[#allocation7 + $0x5]]  ;;  %s1916_s23 = sld [smem:[#allocation7 + $0x6]]  ;;  %v1921_v7 = vpack.c.bf16 %v175_v6, %v174_v4  ;;  %v1932_v10 = vld [vmem:[#allocation8] sm:$0xff]  ;;  %v1940_v12 = vpack.c.bf16 %v177_v9, %v176_v8  ;;  %v178_v13 = vld [vmem:[#allocation13 + $0x30] sm:$0xff]  ;;  %v180_v16 = vld [vmem:[#allocation13 + $0x40] sm:$0xff] }
  0x63   :  { %s1918_s24 = sld [smem:[#allocation7 + $0x7]]  ;;  %1439 = vmatpush3.bf16.msra.mxu1 %v1910_v5  ;;  %s1923_s25 = sld [smem:[#allocation6]]  ;;  %1487 = vmatpush3.bf16.msra.mxu0 %v1910_v5  ;;  %v88_v11 = vmax.f32 %v1932_v10, 0.0  ;;  %v179_v14 = vld [vmem:[#allocation13 + $0x38] sm:$0xff]  ;;  %v181_v17 = vld [vmem:[#allocation13 + $0x48] sm:$0xff]  ;;  %v182_v18 = vld [vmem:[#allocation13 + $0x50] sm:$0xff] }
  0x64   :  { %s1925_s26 = sld [smem:[#allocation6 + $0x1]]  ;;  %1440 = vmatprep.subr.bf16.mxu1 %v1775_v0  ;;  %s1929_s27 = sld [smem:[#allocation6 + $0x2]]  ;;  %1488 = vmatprep.subr.bf16.mxu0 %v1775_v0  ;;  %v1952_v15 = vpack.c.bf16 %v179_v14, %v178_v13  ;;  %v183_v19 = vld [vmem:[#allocation13 + $0x58] sm:$0xff]  ;;  %v1960_v20 = vpack.c.bf16 %v181_v17, %v180_v16  ;;  %v184_v37 = vld [vmem:[#allocation13 + $0x60] sm:$0xff]  ;;  %v185_v38 = vld [vmem:[#allocation13 + $0x68] sm:$0xff] }
  0x65   :  { %s1934_s30 = sld [smem:[#allocation6 + $0x3]]  ;;  %s1937_s2 = sld [smem:[#allocation6 + $0x4]]  ;;  %89 = vst [vmem:[#allocation2] sm:$0xff] %v88_v11  ;;  %v1978_v33 = vpack.c.bf16 %v183_v19, %v182_v18  ;;  %v1988_v40 = vpack.c.bf16 %v185_v38, %v184_v37  ;;  %v186_v41 = vld [vmem:[#allocation13 + $0x70] sm:$0xff]  ;;  %v187_v42 = vld [vmem:[#allocation13 + $0x78] sm:$0xff]  ;;  %v155_v44 = vld [vmem:[#allocation11] sm:$0xff] }
  0x66   :  { %s1942_s9 = sld [smem:[#allocation6 + $0x5]]  ;;  %s1948_s10 = sld [smem:[#allocation6 + $0x6]]  ;;  %v1994_v43 = vpack.c.bf16 %v187_v42, %v186_v41  ;;  %v156_v45 = vld [vmem:[#allocation11 + $0x8] sm:$0xff]  ;;  %v157_v48 = vld [vmem:[#allocation11 + $0x10] sm:$0xff]  ;;  %v158_v49 = vld [vmem:[#allocation11 + $0x18] sm:$0xff] }
  0x67   :  { %1442 = vmatpush3.bf16.msra.mxu1 %v1921_v7  ;;  %1490 = vmatpush3.bf16.msra.mxu0 %v1921_v7  ;;  %s1956_s11 = sld [smem:[#allocation6 + $0x7]]  ;;  %s95_s12 = scalar_lea.vmem [#allocation2], %s1902_s6  ;;  %v2000_v47 = vpack.c.bf16 %v156_v45, %v155_v44  ;;  %v2006_v50 = vpack.c.bf16 %v158_v49, %v157_v48  ;;  %v159_v51 = vld [vmem:[#allocation11 + $0x20] sm:$0xff]  ;;  %v160_v52 = vld [vmem:[#allocation11 + $0x28] sm:$0xff]  ;;  %v161_v54 = vld [vmem:[#allocation11 + $0x30] sm:$0xff] }
  0x68   :  { %1443 = vmatprep.subr.bf16.mxu1 %v1775_v0  ;;  %1491 = vmatprep.subr.bf16.mxu0 %v1775_v0  ;;  %s103_s14 = scalar_lea.vmem [#allocation2], %s1904_s3  ;;  %s111_s15 = scalar_lea.vmem [#allocation2], %s1906_s20  ;;  %v2012_v53 = vpack.c.bf16 %v160_v52, %v159_v51  ;;  %v162_v55 = vld [vmem:[#allocation11 + $0x38] sm:$0xff]  ;;  %v163_v57 = vld [vmem:[#allocation11 + $0x40] sm:$0xff]  ;;  %v164_v58 = vld [vmem:[#allocation11 + $0x48] sm:$0xff] }
  0x69   :  { %s119_s16 = scalar_lea.vmem [#allocation2], %s1908_s1  ;;  %s127_s17 = scalar_lea.vmem [#allocation2], %s1912_s21  ;;  %v2016_v56 = vpack.c.bf16 %v162_v55, %v161_v54  ;;  %v2020_v59 = vpack.c.bf16 %v164_v58, %v163_v57  ;;  %v165_v60 = vld [vmem:[#allocation11 + $0x50] sm:$0xff]  ;;  %v166_v61 = vld [vmem:[#allocation11 + $0x58] sm:$0xff]  ;;  %v167_v63 = vld [vmem:[#allocation11 + $0x60] sm:$0xff] }
  0x6a   :  { %s135_s18 = scalar_lea.vmem [#allocation2], %s1914_s22  ;;  %s143_s19 = scalar_lea.vmem [#allocation2], %s1916_s23  ;;  %v2024_v62 = vpack.c.bf16 %v166_v61, %v165_v60  ;;  %v168_v2 = vld [vmem:[#allocation11 + $0x68] sm:$0xff]  ;;  %v169_v4 = vld [vmem:[#allocation11 + $0x70] sm:$0xff]  ;;  %v170_v6 = vld [vmem:[#allocation11 + $0x78] sm:$0xff] }
  0x6b   :  { %1445 = vmatpush3.bf16.msra.mxu1 %v1940_v12  ;;  %1493 = vmatpush3.bf16.msra.mxu0 %v1940_v12  ;;  %s151_s0 = scalar_lea.vmem [#allocation2], %s1918_s24  ;;  %s92_s4 = scalar_lea.vmem [#allocation2], %s1923_s25  ;;  %v2028_v3 = vpack.c.bf16 %v168_v2, %v167_v63  ;;  %v2032_v8 = vpack.c.bf16 %v170_v6, %v169_v4  ;;  %v2058_v16 = vld [vmem:[%s2217_s5] ss:$0 sm:$0xff]  ;;  %v840_v60 = vld [vmem:[#allocation14 + $0x10] sm:$0xff]  ;;  %v841_v61 = vld [vmem:[#allocation14 + $0x18] sm:$0xff] }
  0x6c   :  { %1446 = vmatprep.subr.bf16.mxu1 %v1775_v0  ;;  %1494 = vmatprep.subr.bf16.mxu0 %v1775_v0  ;;  %v96_v21 = vld [vmem:[%s95_s12] sm:$0x1]  ;;  %s100_s13 = scalar_lea.vmem [#allocation2], %s1925_s26  ;;  %s108_s6 = scalar_lea.vmem [#allocation2], %s1929_s27  ;;  %v842_v2 = vld [vmem:[#allocation14 + $0x20] sm:$0xff] }
  0x6d   :  { %v104_v22 = vld [vmem:[%s103_s14] sm:$0x1]  ;;  %97 = vst [vmem:[#allocation4] sm:$0x1] %v96_v21  ;;  %s116_s3 = scalar_lea.vmem [#allocation2], %s1934_s30  ;;  %s124_s20 = scalar_lea.vmem [#allocation2], %s1937_s2 }
  0x6e   :  { %v112_v23 = vld [vmem:[%s111_s15] sm:$0x1]  ;;  %105 = vst [vmem:[#allocation4 + $0x1] sm:$0x1] %v104_v22  ;;  %s132_s1 = scalar_lea.vmem [#allocation2], %s1942_s9  ;;  %s140_s21 = scalar_lea.vmem [#allocation2], %s1948_s10 }
  0x6f   :  { %1448 = vmatpush3.bf16.msra.mxu1 %v1952_v15  ;;  %1496 = vmatpush3.bf16.msra.mxu0 %v1952_v15  ;;  %113 = vst [vmem:[#allocation4 + $0x2] sm:$0x1] %v112_v23  ;;  %v120_v24 = vld [vmem:[%s119_s16] sm:$0x1]  ;;  %s148_s22 = scalar_lea.vmem [#allocation2], %s1956_s11  ;;  %s1033_s23 = sld [smem:[#allocation7 + $0x8]] }
  0x70   :  { %1449 = vmatprep.subr.bf16.mxu1 %v1775_v0  ;;  %v128_v25 = vld [vmem:[%s127_s17] sm:$0x1]  ;;  %1497 = vmatprep.subr.bf16.mxu0 %v1775_v0  ;;  %121 = vst [vmem:[#allocation4 + $0x3] sm:$0x1] %v120_v24  ;;  %s1035_s24 = sld [smem:[#allocation7 + $0x9]]  ;;  %s1037_s27 = sld [smem:[#allocation7 + $0xa]] }
  0x71   :  { %v136_v26 = vld [vmem:[%s135_s18] sm:$0x1]  ;;  %129 = vst [vmem:[#allocation4 + $0x4] sm:$0x1] %v128_v25  ;;  %s2060_s30 = sld [smem:[#allocation7 + $0xb]]  ;;  %s2062_s2 = sld [smem:[#allocation7 + $0xc]] }
  0x72   :  { %137 = vst [vmem:[#allocation4 + $0x5] sm:$0x1] %v136_v26  ;;  %v144_v27 = vld [vmem:[%s143_s19] sm:$0x1]  ;;  %s2064_s9 = sld [smem:[#allocation7 + $0xd]]  ;;  %s2066_s10 = sld [smem:[#allocation7 + $0xe]] }
  0x73   :  { %v152_v28 = vld [vmem:[%s151_s0] sm:$0x1]  ;;  %145 = vst [vmem:[#allocation4 + $0x6] sm:$0x1] %v144_v27  ;;  %1451 = vmatpush3.bf16.msra.mxu1 %v1960_v20  ;;  %1499 = vmatpush3.bf16.msra.mxu0 %v1960_v20  ;;  %s2068_s11 = sld [smem:[#allocation7 + $0xf]]  ;;  %s2070_s12 = sld [smem:[#allocation6 + $0x8]] }
  0x74   :  { %v93_v29 = vld [vmem:[%s92_s4] sm:$0x1]  ;;  %153 = vst [vmem:[#allocation4 + $0x7] sm:$0x1] %v152_v28  ;;  %1452 = vmatprep.subr.bf16.mxu1 %v1775_v0  ;;  %1500 = vmatprep.subr.bf16.mxu0 %v1775_v0  ;;  %s2072_s14 = sld [smem:[#allocation6 + $0x9]]  ;;  %s2077_s5 = sld [smem:[#allocation6 + $0xa]] }
  0x75   :  { %94 = vst [vmem:[#allocation3] sm:$0x1] %v93_v29  ;;  %v101_v30 = vld [vmem:[%s100_s13] sm:$0x1]  ;;  %s2079_s15 = sld [smem:[#allocation6 + $0xb]]  ;;  %s2081_s16 = sld [smem:[#allocation6 + $0xc]] }
  0x76   :  { %v109_v31 = vld [vmem:[%s108_s6] sm:$0x1]  ;;  %102 = vst [vmem:[#allocation3 + $0x1] sm:$0x1] %v101_v30  ;;  %s2083_s17 = sld [smem:[#allocation6 + $0xd]]  ;;  %s2086_s18 = sld [smem:[#allocation6 + $0xe]] }
  0x77   :  { %v117_v32 = vld [vmem:[%s116_s3] sm:$0x1]  ;;  %110 = vst [vmem:[#allocation3 + $0x2] sm:$0x1] %v109_v31  ;;  %1454 = vmatpush3.bf16.msra.mxu1 %v1978_v33  ;;  %1502 = vmatpush3.bf16.msra.mxu0 %v1978_v33  ;;  %s2088_s19 = sld [smem:[#allocation6 + $0xf]]  ;;  %s343_s0 = scalar_lea.vmem [#allocation2], %s1033_s23 }
  0x78   :  { %118 = vst [vmem:[#allocation3 + $0x3] sm:$0x1] %v117_v32  ;;  %v125_v34 = vld [vmem:[%s124_s20] sm:$0x1]  ;;  %1455 = vmatprep.subr.bf16.mxu1 %v1775_v0  ;;  %1503 = vmatprep.subr.bf16.mxu0 %v1775_v0  ;;  %s351_s4 = scalar_lea.vmem [#allocation2], %s1035_s24  ;;  %s359_s13 = scalar_lea.vmem [#allocation2], %s1037_s27 }
  0x79   :  { %v133_v35 = vld [vmem:[%s132_s1] sm:$0x1]  ;;  %126 = vst [vmem:[#allocation3 + $0x4] sm:$0x1] %v125_v34  ;;  %s367_s6 = scalar_lea.vmem [#allocation2], %s2060_s30  ;;  %s375_s3 = scalar_lea.vmem [#allocation2], %s2062_s2 }
  0x7a   :  { %v141_v36 = vld [vmem:[%s140_s21] sm:$0x1]  ;;  %134 = vst [vmem:[#allocation3 + $0x5] sm:$0x1] %v133_v35  ;;  %s383_s20 = scalar_lea.vmem [#allocation2], %s2064_s9  ;;  %s391_s1 = scalar_lea.vmem [#allocation2], %s2066_s10 }
  0x7b   :  { %142 = vst [vmem:[#allocation3 + $0x6] sm:$0x1] %v141_v36  ;;  %v149_v39 = vld [vmem:[%s148_s22] sm:$0x1]  ;;  %1457 = vmatpush3.bf16.msra.mxu1 %v1988_v40  ;;  %1505 = vmatpush3.bf16.msra.mxu0 %v1988_v40  ;;  %v171_v46 = vld [vmem:[#allocation4] sm:$0xff]  ;;  %s399_s21 = scalar_lea.vmem [#allocation2], %s2068_s11 }
  0x7c   :  { %150 = vst [vmem:[#allocation3 + $0x7] sm:$0x1] %v149_v39  ;;  %1458 = vmatprep.subr.bf16.mxu1 %v1775_v0  ;;  %1506 = vmatprep.subr.bf16.mxu0 %v1775_v0  ;;  %s340_s22 = scalar_lea.vmem [#allocation2], %s2070_s12  ;;  %s348_s23 = scalar_lea.vmem [#allocation2], %s2072_s14 }
  0x7d   :  { %s356_s24 = scalar_lea.vmem [#allocation2], %s2077_s5  ;;  %s364_s25 = scalar_lea.vmem [#allocation2], %s2079_s15 }
  0x7e   :  { %s372_s26 = scalar_lea.vmem [#allocation2], %s2081_s16  ;;  %s380_s27 = scalar_lea.vmem [#allocation2], %s2083_s17 }
  0x7f   :  { %1460 = vmatpush3.bf16.msra.mxu1 %v1994_v43  ;;  %1508 = vmatpush3.bf16.msra.mxu0 %v1994_v43  ;;  %s388_s30 = scalar_lea.vmem [#allocation2], %s2086_s18  ;;  %s396_s2 = scalar_lea.vmem [#allocation2], %s2088_s19 }
  0x80   :  { %1461 = vmatprep.subr.bf16.mxu1 %v1775_v0  ;;  %1533 = vmatprep.subr.bf16.mxu0 %v1775_v0  ;;  %s1050_s9 = sld [smem:[#allocation7 + $0x10]]  ;;  %s1052_s10 = sld [smem:[#allocation7 + $0x11]] }
  0x81   :  { %s1054_s11 = sld [smem:[#allocation7 + $0x12]]  ;;  %s2142_s12 = sld [smem:[#allocation7 + $0x13]] }
  0x82   :  { %1222 = vmatmul.mubr.f32.vlgmr.msra.gmra.mrb[0].mxu1 %v171_v46  ;;  %s2144_s14 = sld [smem:[#allocation7 + $0x14]]  ;;  %s2146_s5 = sld [smem:[#allocation7 + $0x15]] }
  0x83   :  { %1463 = vmatpush3.bf16.msra.mxu1 %v2000_v47  ;;  %1256 = vmatprep.mubr.msk.f32.mxu1 %vm1776_vm0, %v1777_v1  ;;  %v154_v9 = vld [vmem:[#allocation3] sm:$0xff]  ;;  %s2148_s15 = sld [smem:[#allocation7 + $0x16]]  ;;  %s2150_s16 = sld [smem:[#allocation7 + $0x17]] }
  0x84   :  { %1464 = vmatprep.subr.bf16.mxu1 %v1775_v0  ;;  %s2152_s17 = sld [smem:[#allocation6 + $0x10]]  ;;  %s2154_s18 = sld [smem:[#allocation6 + $0x11]] }
  0x85   :  { %s2159_s19 = sld [smem:[#allocation6 + $0x12]] }
  0x87   :  { %1466 = vmatpush3.bf16.msra.mxu1 %v2006_v50 }
  0x88   :  { %1467 = vmatprep.subr.bf16.mxu1 %v1775_v0 }
  0x8b   :  { %1469 = vmatpush3.bf16.msra.mxu1 %v2012_v53 }
  0x8c   :  { %1470 = vmatprep.subr.bf16.mxu1 %v1775_v0 }
  0x8f   :  { %1472 = vmatpush3.bf16.msra.mxu1 %v2016_v56 }
  0x90   :  { %1473 = vmatprep.subr.bf16.mxu1 %v1775_v0 }
  0x93   :  { %1475 = vmatpush3.bf16.msra.mxu1 %v2020_v59 }
  0x94   :  { %1476 = vmatprep.subr.bf16.mxu1 %v1775_v0 }
  0x97   :  { %1478 = vmatpush3.bf16.msra.mxu1 %v2024_v62 }
  0x98   :  { %1479 = vmatprep.subr.bf16.mxu1 %v1775_v0 }
  0x9b   :  { %1481 = vmatpush3.bf16.msra.mxu1 %v2028_v3 }
  0x9c   :  { %1482 = vmatprep.subr.bf16.mxu1 %v1775_v0 }
  0x9f   :  { %1484 = vmatpush3.bf16.msra.mxu1 %v2032_v8 }
  0xa0   :  { %1509 = vmatprep.subr.bf16.mxu1 %v1775_v0 }
  0xa2   :  { %1257 = vmatmul.mubr.f32.vlgmr.msra.gmra.mrb[2].mxu1 %v154_v9  ;;  %v845_v9 = vld [vmem:[#allocation14 + $0x38] sm:$0xff] }
  0xa3   :  { %1511 = vmatpush3.bf16.msra.mxu1 %v2000_v47  ;;  %1326 = vmatprep.mubr.msk.f32.mxu1 %vm1776_vm0, %v1777_v1 }
  0xa4   :  { %1512 = vmatprep.subr.bf16.mxu1 %v1775_v0 }
  0xa7   :  { %1514 = vmatpush3.bf16.msra.mxu1 %v2006_v50 }
  0xa8   :  { %1515 = vmatprep.subr.bf16.mxu1 %v1775_v0 }
  0xab   :  { %1517 = vmatpush3.bf16.msra.mxu1 %v2012_v53 }
  0xac   :  { %1518 = vmatprep.subr.bf16.mxu1 %v1775_v0 }
  0xaf   :  { %1520 = vmatpush3.bf16.msra.mxu1 %v2016_v56 }
  0xb0   :  { %1521 = vmatprep.subr.bf16.mxu1 %v1775_v0 }
  0xb3   :  { %1523 = vmatpush3.bf16.msra.mxu1 %v2020_v59 }
  0xb4   :  { %1524 = vmatprep.subr.bf16.mxu1 %v1775_v0 }
  0xb7   :  { %1526 = vmatpush3.bf16.msra.mxu1 %v2024_v62 }
  0xb8   :  { %1527 = vmatprep.subr.bf16.mxu1 %v1775_v0 }
  0xbb   :  { %1529 = vmatpush3.bf16.msra.mxu1 %v2028_v3 }
  0xbc   :  { %1530 = vmatprep.subr.bf16.mxu1 %v1775_v0 }
  0xbf   :  { %1532 = vmatpush3.bf16.msra.mxu1 %v2032_v8 }
  0xc0   :  { %1557 = vmatprep.subr.bf16.mxu1 %v1775_v0 }
 0x155   :  { %v254_v13 = vpop.f32.mrb[0].mxu1 }
 0x156   :  { %v1223_v14 = vpop.f32.mrb[1].mxu1 }
 0x157   :  { %v846_v14 = vld [vmem:[#allocation14 + $0x40] sm:$0xff] }
 0x175   :  { %v324_v17 = vpop.f32.mrb[2].mxu1 }
 0x176   :  { %v325_v18 = vadd.f32 %v324_v17, %v254_v13  ;;  %v1258_v19 = vpop.f32.mrb[3].mxu1  ;;  %v847_v17 = vld [vmem:[#allocation14 + $0x48] sm:$0xff] }
 0x177   :  { %v848_v19 = vld [vmem:[#allocation14 + $0x50] sm:$0xff] }
 0x178   :  { %v2075_v21 = vadd.f32 %v2058_v16, %v325_v18  ;;  %v1597_v18 = vpack.c.bf16 %v847_v17, %v846_v14 }
 0x17a   :  { %v336_v22 = vmax.f32 %v2075_v21, 0.0 }
 0x17c   :  { %337 = vst [vmem:[#allocation2 + $0x8] sm:$0xff] %v336_v22 }
 0x183   :  { %v344_v23 = vld [vmem:[%s343_s0] sm:$0x1]  ;;  %s2161_s0 = sld [smem:[#allocation6 + $0x13]] }
 0x184   :  { %v352_v24 = vld [vmem:[%s351_s4] sm:$0x1]  ;;  %345 = vst [vmem:[#allocation4] sm:$0x1] %v344_v23  ;;  %s2163_s4 = sld [smem:[#allocation6 + $0x14]]  ;;  %v849_v23 = vld [vmem:[#allocation14 + $0x58] sm:$0xff] }
 0x185   :  { %v360_v25 = vld [vmem:[%s359_s13] sm:$0x1]  ;;  %353 = vst [vmem:[#allocation4 + $0x1] sm:$0x1] %v352_v24  ;;  %s2165_s13 = sld [smem:[#allocation6 + $0x15]]  ;;  %v1601_v10 = vpack.c.bf16 %v849_v23, %v848_v19 }
 0x186   :  { %361 = vst [vmem:[#allocation4 + $0x2] sm:$0x1] %v360_v25  ;;  %v368_v26 = vld [vmem:[%s367_s6] sm:$0x1]  ;;  %s2168_s6 = sld [smem:[#allocation6 + $0x16]] }
 0x187   :  { %v376_v27 = vld [vmem:[%s375_s3] sm:$0x1]  ;;  %369 = vst [vmem:[#allocation4 + $0x3] sm:$0x1] %v368_v26  ;;  %s2170_s3 = sld [smem:[#allocation6 + $0x17]]  ;;  %v852_v26 = vld [vmem:[#allocation14 + $0x70] sm:$0xff] }
 0x188   :  { %v384_v28 = vld [vmem:[%s383_s20] sm:$0x1]  ;;  %377 = vst [vmem:[#allocation4 + $0x4] sm:$0x1] %v376_v27  ;;  %s591_s20 = scalar_lea.vmem [#allocation2], %s1050_s9  ;;  %v853_v27 = vld [vmem:[#allocation14 + $0x78] sm:$0xff] }
 0x189   :  { %385 = vst [vmem:[#allocation4 + $0x5] sm:$0x1] %v384_v28  ;;  %v392_v29 = vld [vmem:[%s391_s1] sm:$0x1]  ;;  %s599_s1 = scalar_lea.vmem [#allocation2], %s1052_s10  ;;  %s612_s9 = scalar_lea.vmem [#allocation2], %s2161_s0  ;;  %v1609_v28 = vpack.c.bf16 %v853_v27, %v852_v26 }
 0x18a   :  { %v400_v30 = vld [vmem:[%s399_s21] sm:$0x1]  ;;  %393 = vst [vmem:[#allocation4 + $0x6] sm:$0x1] %v392_v29  ;;  %s607_s21 = scalar_lea.vmem [#allocation2], %s1054_s11  ;;  %s620_s10 = scalar_lea.vmem [#allocation2], %s2163_s4 }
 0x18b   :  { %v341_v31 = vld [vmem:[%s340_s22] sm:$0x1]  ;;  %401 = vst [vmem:[#allocation4 + $0x7] sm:$0x1] %v400_v30  ;;  %s615_s22 = scalar_lea.vmem [#allocation2], %s2142_s12  ;;  %s628_s11 = scalar_lea.vmem [#allocation2], %s2165_s13 }
 0x18c   :  { %342 = vst [vmem:[#allocation3] sm:$0x1] %v341_v31  ;;  %v349_v32 = vld [vmem:[%s348_s23] sm:$0x1]  ;;  %s623_s23 = scalar_lea.vmem [#allocation2], %s2144_s14  ;;  %s636_s12 = scalar_lea.vmem [#allocation2], %s2168_s6 }
 0x18d   :  { %v357_v34 = vld [vmem:[%s356_s24] sm:$0x1]  ;;  %350 = vst [vmem:[#allocation3 + $0x1] sm:$0x1] %v349_v32  ;;  %s631_s24 = scalar_lea.vmem [#allocation2], %s2146_s5  ;;  %s644_s14 = scalar_lea.vmem [#allocation2], %s2170_s3 }
 0x18e   :  { %v365_v35 = vld [vmem:[%s364_s25] sm:$0x1]  ;;  %358 = vst [vmem:[#allocation3 + $0x2] sm:$0x1] %v357_v34  ;;  %s639_s25 = scalar_lea.vmem [#allocation2], %s2148_s15 }
 0x18f   :  { %366 = vst [vmem:[#allocation3 + $0x3] sm:$0x1] %v365_v35  ;;  %v373_v36 = vld [vmem:[%s372_s26] sm:$0x1]  ;;  %s647_s26 = scalar_lea.vmem [#allocation2], %s2150_s16  ;;  %s1778_s16 = smov [#allocation16]  }
 0x190   :  { %v381_v37 = vld [vmem:[%s380_s27] sm:$0x1]  ;;  %374 = vst [vmem:[#allocation3 + $0x4] sm:$0x1] %v373_v36  ;;  %s588_s27 = scalar_lea.vmem [#allocation2], %s2152_s17  ;;  %s955_s17 = sshll.u32 %s1778_s16, 4  ;;  %s956_s17 = int_to_ptr.vmem [resolvable:$true] %s955_s17 }
 0x191   :  { %v389_v38 = vld [vmem:[%s388_s30] sm:$0x1]  ;;  %382 = vst [vmem:[#allocation3 + $0x5] sm:$0x1] %v381_v37  ;;  %s596_s30 = scalar_lea.vmem [#allocation2], %s2154_s18  ;;  %s1735_s18 = scalar_lea.vmem %s956_s17, 512 }
 0x192   :  { %390 = vst [vmem:[#allocation3 + $0x6] sm:$0x1] %v389_v38  ;;  %v397_v39 = vld [vmem:[%s396_s2] sm:$0x1]  ;;  %v419_v41 = vld [vmem:[#allocation4] sm:$0xff]  ;;  %s604_s2 = scalar_lea.vmem [#allocation2], %s2159_s19  ;;  %p1736_p12 = scmp.ne.s32.totalorder %s956_s17, %s1735_s18 }
 0x193   :  { %398 = vst [vmem:[#allocation3 + $0x7] sm:$0x1] %v397_v39  ;;  %1292 = vmatmul.mubr.f32.vlgmr.msra.gmra.mrb[0].mxu0 %v419_v41  ;;  %v851_v24 = vld [vmem:[#allocation14 + $0x68] sm:$0xff]  ;;  %p1740_p13 = scmp.lt.s32.totalorder %s956_s17, %s956_s17  ;;  %p1741_p0 = scmp.lt.s32.totalorder %s1735_s18, %s1735_s18 }
 0x194   :  { %1535 = vmatpush3.bf16.msra.mxu0 %v1910_v5  ;;  %1361 = vmatprep.mubr.msk.f32.mxu0 %vm1776_vm0, %v1777_v1  ;;  %v839_v5 = vld [vmem:[#allocation14 + $0x8] sm:$0xff] }
 0x195   :  { %1536 = vmatprep.subr.bf16.mxu0 %v1775_v0  ;;  %v1066_v37 = vld [vmem:[%s2219_s7] ss:$0 sm:$0xff]  ;;  %p1742_p1 = por %p1741_p0, %p1740_p13 }
 0x197   :  { %p1743_p2 = pnand %p1742_p1, %p1736_p12 }
 0x198   :  { %1538 = vmatpush3.bf16.msra.mxu0 %v1921_v7 }
 0x199   :  { %1539 = vmatprep.subr.bf16.mxu0 %v1775_v0 }
 0x19a   :  { %v402_v42 = vld [vmem:[#allocation3] sm:$0xff] }
 0x19b   :  { %1327 = vmatmul.mubr.f32.vlgmr.msra.gmra.mrb[4].mxu1 %v402_v42 }
 0x19c   :  { %1559 = vmatpush3.bf16.msra.mxu1 %v2000_v47  ;;  %1396 = vmatprep.mubr.msk.f32.mxu1 %vm1776_vm0, %v1777_v1  ;;  %v838_v1 = vld [vmem:[#allocation14] sm:$0xff] }
 0x19d   :  { %1560 = vmatprep.subr.bf16.mxu1 %v1775_v0  ;;  %1541 = vmatpush3.bf16.msra.mxu0 %v1940_v12  ;;  %v2139_v7 = vpack.c.bf16 %v839_v5, %v838_v1 }
 0x19e   :  { %1542 = vmatprep.subr.bf16.mxu0 %v1775_v0 }
 0x1a0   :  { %1562 = vmatpush3.bf16.msra.mxu1 %v2006_v50 }
 0x1a1   :  { %1563 = vmatprep.subr.bf16.mxu1 %v1775_v0  ;;  %1544 = vmatpush3.bf16.msra.mxu0 %v1952_v15 }
 0x1a2   :  { %1545 = vmatprep.subr.bf16.mxu0 %v1775_v0 }
 0x1a4   :  { %1565 = vmatpush3.bf16.msra.mxu1 %v2012_v53 }
 0x1a5   :  { %1566 = vmatprep.subr.bf16.mxu1 %v1775_v0  ;;  %1547 = vmatpush3.bf16.msra.mxu0 %v1960_v20 }
 0x1a6   :  { %1548 = vmatprep.subr.bf16.mxu0 %v1775_v0 }
 0x1a8   :  { %1568 = vmatpush3.bf16.msra.mxu1 %v2016_v56 }
 0x1a9   :  { %1569 = vmatprep.subr.bf16.mxu1 %v1775_v0  ;;  %1550 = vmatpush3.bf16.msra.mxu0 %v1978_v33 }
 0x1aa   :  { %1551 = vmatprep.subr.bf16.mxu0 %v1775_v0 }
 0x1ac   :  { %1571 = vmatpush3.bf16.msra.mxu1 %v2020_v59 }
 0x1ad   :  { %1572 = vmatprep.subr.bf16.mxu1 %v1775_v0  ;;  %1553 = vmatpush3.bf16.msra.mxu0 %v1988_v40 }
 0x1ae   :  { %1554 = vmatprep.subr.bf16.mxu0 %v1775_v0 }
 0x1b0   :  { %1574 = vmatpush3.bf16.msra.mxu1 %v2024_v62  ;;  %v1585_v62 = vpack.c.bf16 %v841_v61, %v840_v60 }
 0x1b1   :  { %1575 = vmatprep.subr.bf16.mxu1 %v1775_v0  ;;  %1556 = vmatpush3.bf16.msra.mxu0 %v1994_v43 }
 0x1b2   :  { %1582 = vmatprep.subr.bf16.mxu0 %v2139_v7 }
 0x1b4   :  { %1577 = vmatpush3.bf16.msra.mxu1 %v2028_v3  ;;  %v843_v3 = vld [vmem:[#allocation14 + $0x28] sm:$0xff] }
 0x1b5   :  { %1578 = vmatprep.subr.bf16.mxu1 %v1775_v0  ;;  %v1589_v6 = vpack.c.bf16 %v843_v3, %v842_v2 }
 0x1b8   :  { %1580 = vmatpush3.bf16.msra.mxu1 %v2032_v8  ;;  %v844_v8 = vld [vmem:[#allocation14 + $0x30] sm:$0xff] }
 0x1b9   :  { %v1593_v13 = vpack.c.bf16 %v845_v9, %v844_v8 }
 0x266   :  { %v502_v12 = vpop.f32.mrb[0].mxu0 }
 0x267   :  { %v1293_v15 = vpop.f32.mrb[1].mxu0 }
 0x26e   :  { %v572_v20 = vpop.f32.mrb[4].mxu1 }
 0x26f   :  { %v573_v0 = vadd.f32 %v572_v20, %v502_v12  ;;  %v1328_v33 = vpop.f32.mrb[5].mxu1 }
 0x271   :  { %v2157_v40 = vadd.f32 %v2058_v16, %v573_v0 }
 0x273   :  { %v584_v43 = vmax.f32 %v2157_v40, 0.0 }
 0x275   :  { %585 = vst [vmem:[#allocation2 + $0x10] sm:$0xff] %v584_v43 }
 0x27c   :  { %v592_v44 = vld [vmem:[%s591_s20] sm:$0x1] }
 0x27d   :  { %v600_v45 = vld [vmem:[%s599_s1] sm:$0x1]  ;;  %593 = vst [vmem:[#allocation4] sm:$0x1] %v592_v44 }
 0x27e   :  { %v608_v46 = vld [vmem:[%s607_s21] sm:$0x1]  ;;  %601 = vst [vmem:[#allocation4 + $0x1] sm:$0x1] %v600_v45 }
 0x27f   :  { %609 = vst [vmem:[#allocation4 + $0x2] sm:$0x1] %v608_v46  ;;  %v616_v47 = vld [vmem:[%s615_s22] sm:$0x1] }
 0x280   :  { %v624_v48 = vld [vmem:[%s623_s23] sm:$0x1]  ;;  %617 = vst [vmem:[#allocation4 + $0x3] sm:$0x1] %v616_v47 }
 0x281   :  { %v632_v49 = vld [vmem:[%s631_s24] sm:$0x1]  ;;  %625 = vst [vmem:[#allocation4 + $0x4] sm:$0x1] %v624_v48 }
 0x282   :  { %633 = vst [vmem:[#allocation4 + $0x5] sm:$0x1] %v632_v49  ;;  %v640_v50 = vld [vmem:[%s639_s25] sm:$0x1] }
 0x283   :  { %v648_v51 = vld [vmem:[%s647_s26] sm:$0x1]  ;;  %641 = vst [vmem:[#allocation4 + $0x6] sm:$0x1] %v640_v50 }
 0x284   :  { %v589_v52 = vld [vmem:[%s588_s27] sm:$0x1]  ;;  %649 = vst [vmem:[#allocation4 + $0x7] sm:$0x1] %v648_v51 }
 0x285   :  { %590 = vst [vmem:[#allocation3] sm:$0x1] %v589_v52  ;;  %v597_v53 = vld [vmem:[%s596_s30] sm:$0x1] }
 0x286   :  { %v605_v54 = vld [vmem:[%s604_s2] sm:$0x1]  ;;  %598 = vst [vmem:[#allocation3 + $0x1] sm:$0x1] %v597_v53 }
 0x287   :  { %v613_v55 = vld [vmem:[%s612_s9] sm:$0x1]  ;;  %606 = vst [vmem:[#allocation3 + $0x2] sm:$0x1] %v605_v54 }
 0x288   :  { %614 = vst [vmem:[#allocation3 + $0x3] sm:$0x1] %v613_v55  ;;  %v621_v56 = vld [vmem:[%s620_s10] sm:$0x1] }
 0x289   :  { %v629_v57 = vld [vmem:[%s628_s11] sm:$0x1]  ;;  %622 = vst [vmem:[#allocation3 + $0x4] sm:$0x1] %v621_v56 }
 0x28a   :  { %v637_v58 = vld [vmem:[%s636_s12] sm:$0x1]  ;;  %630 = vst [vmem:[#allocation3 + $0x5] sm:$0x1] %v629_v57 }
 0x28b   :  { %638 = vst [vmem:[#allocation3 + $0x6] sm:$0x1] %v637_v58  ;;  %v645_v59 = vld [vmem:[%s644_s14] sm:$0x1]  ;;  %v667_v63 = vld [vmem:[#allocation4] sm:$0xff] }
 0x28c   :  { %646 = vst [vmem:[#allocation3 + $0x7] sm:$0x1] %v645_v59  ;;  %1362 = vmatmul.mubr.f32.vlgmr.msra.gmra.mrb[2].mxu0 %v667_v63 }
 0x28d   :  { %1584 = vmatpush3.bf16.msra.mxu0 %v2139_v7  ;;  %1431 = vmatprep.mubr.f32.mxu0 %v88_v11  ;;  %v850_v11 = vld [vmem:[#allocation14 + $0x60] sm:$0xff] }
 0x28e   :  { %1586 = vmatprep.subr.bf16.mxu0 %v1585_v62  ;;  %v1605_v25 = vpack.c.bf16 %v851_v24, %v850_v11 }
 0x291   :  { %1588 = vmatpush3.bf16.msra.mxu0 %v1585_v62 }
 0x292   :  { %1590 = vmatprep.subr.bf16.mxu0 %v1589_v6 }
 0x293   :  { %v650_v4 = vld [vmem:[#allocation3] sm:$0xff] }
 0x294   :  { %1397 = vmatmul.mubr.f32.vlgmr.msra.gmra.mrb[6].mxu1 %v650_v4 }
 0x295   :  { %1592 = vmatpush3.bf16.msra.mxu0 %v1589_v6 }
 0x296   :  { %1594 = vmatprep.subr.bf16.mxu0 %v1593_v13 }
 0x299   :  { %1596 = vmatpush3.bf16.msra.mxu0 %v1593_v13 }
 0x29a   :  { %1598 = vmatprep.subr.bf16.mxu0 %v1597_v18 }
 0x29d   :  { %1600 = vmatpush3.bf16.msra.mxu0 %v1597_v18 }
 0x29e   :  { %1602 = vmatprep.subr.bf16.mxu0 %v1601_v10 }
 0x2a1   :  { %1604 = vmatpush3.bf16.msra.mxu0 %v1601_v10 }
 0x2a2   :  { %1606 = vmatprep.subr.bf16.mxu0 %v1605_v25 }
 0x2a5   :  { %1608 = vmatpush3.bf16.msra.mxu0 %v1605_v25 }
 0x2a6   :  { %1610 = vmatprep.subr.bf16.mxu0 %v1609_v28 }
 0x2a9   :  { %1612 = vmatpush3.bf16.msra.mxu0 %v1609_v28 }
 0x2ac   :  { %1432 = vmatmul.mubr.f32.vlgmr.msra.gmra.mrb[4].mxu0 %v336_v22 }
 0x2ad   :  { %1434 = vmatprep.mubr.f32.mxu0 %v584_v43 }
 0x35f   :  { %v750_v29 = vpop.f32.mrb[2].mxu0 }
 0x360   :  { %v1363_v30 = vpop.f32.mrb[3].mxu0 }
 0x367   :  { %v820_v31 = vpop.f32.mrb[6].mxu1 }
 0x368   :  { %v821_v32 = vadd.f32 %v820_v31, %v750_v29  ;;  %v1398_v34 = vpop.f32.mrb[7].mxu1 }
 0x36a   :  { %v831_v35 = vadd.f32 %v2058_v16, %v821_v32 }
 0x36c   :  { %v832_v36 = vmax.f32 %v831_v35, 0.0 }
 0x36e   :  { %833 = vst [vmem:[#allocation2 + $0x18] sm:$0xff] %v832_v36  ;;  %1435 = vmatmul.mubr.f32.gmra.mrb[6].mxu0 %v832_v36 }
 0x37f   :  { %v1433_v38 = vpop.f32.mrb[4].mxu0 }
 0x380   :  { %v933_v21 = vadd.f32 %v1433_v38, %v1066_v37  ;;  %v927_v22 = vpop.f32.mrb[5].mxu0 }
 0x381   :  { %v928_v39 = vadd.f32 %v1066_v37, %v927_v22 }
 0x382   :  { %947 = vst [vmem:[#allocation16 + $0x8] sm:$0xff] %v933_v21 }
 0x383   :  { %946 = vst [vmem:[#allocation16] sm:$0xff] %v928_v39 }
 0x441   :  { %v1436_v41 = vpop.f32.mrb[6].mxu0 }
 0x442   :  { %v943_v42 = vadd.f32 %v1436_v41, %v1066_v37  ;;  %v937_v1 = vpop.f32.mrb[7].mxu0 }
 0x443   :  { %v938_v5 = vadd.f32 %v1066_v37, %v937_v1 }
 0x444   :  { %949 = vst [vmem:[#allocation16 + $0x18] sm:$0xff] %v943_v42 }
 0x445   :  { %948 = vst [vmem:[#allocation16 + $0x10] sm:$0xff] %v938_v5 }
 0x446   :  { %1746 = shalt.err (!%p1743_p2)
}
 0x447   :  { %s1747_s0 = scalar_lea.hbm %s2220_s8, 512 }
 0x448   :  { %p1748_p3 = scmp.ne.s32.totalorder %s2220_s8, %s1747_s0  ;;  %p1751_p4 = scmp.lt.u32.totalorder %s1747_s0, %s2220_s8 }
 0x44a   :  { %p1753_p5 = pnand %p1751_p4, %p1748_p3 }
 0x44c   :  { %1756 = shalt.err (!%p1753_p5)
}
 0x44d   :  { %961 = dma.vmem_to_hbm [thread:$0]  %s956_s17, 512, %s2220_s8, [#allocation10], %s1770_s28, %s1770_s28, %s1771_s29  }
 0x44e   :  { %1765 = dma.done.wait [#allocation10], 512  }
 0x44f   :  { %1766 = vsyncadd [#allocation10], 4294966784 }
 0x450   :  { %965 = vsyncpa [#allocation9], 1 }
 0x451   :  { %966 = vsyncpa [#allocation12], 1 }
 0x452   :  { %967 = vsyncpa [#allocation15], 1 }
 0x453   :  { %968 = vsyncpa [#allocation10], 1 }

</bundles_post_ra>
